<compile_context>
chip_gen: v7x
topology: tpu7x:2x2x1
jax: 0.10.0
libtpu: 0.0.40
codegen_flags: <defaults>
</compile_context>

<pallas_src>
import jax
import jax.numpy as jnp
from jax.experimental import pallas as pl
from jax.experimental.pallas import tpu as pltpu


# --------------------------------------------------------------------------- #
# Kernel
# --------------------------------------------------------------------------- #
def _spacial_attention_kernel(hk_ref, feats_ref, wvT_ref, wa_ref, out_ref):
    """One grid step processes a tile of TB batch elements.

    Ref shapes (VMEM blocks):
      hk_ref    : (B, Ap)      f32   wh(key) + wh.bias + wv.bias, zero-padded to Ap
      feats_ref : (TB, N, Fp)  f32 or bf16 (streaming dtype)
      wvT_ref   : (Fp, Ap)     same dtype as feats   wv.weight.T, zero-padded
      wa_ref    : (1, Ap)      f32   wa.weight, zero-padded
      out_ref   : (TB, Fp)     f32   attended features (lane-dense slab)
    """
    tb, n, fp = feats_ref.shape
    ap = wvT_ref.shape[1]

    # wv(feats) fused over the whole batch tile: one (TB*N, Fp) @ (Fp, Ap) MXU
    # pass with f32 accumulation.  The leading-dim collapse is a pure layout
    # no-op when N is sublane-aligned and Fp is a multiple of 128 (both hold in
    # the demo; with unaligned N it is still correct, just a local relayout).
    v = jnp.dot(feats_ref[...].reshape(tb * n, fp), wvT_ref[...],
                preferred_element_type=jnp.float32)                # (TB*N, Ap) f32
    v = v.reshape(tb, n, ap)                                       # (TB, N, Ap)

    # torch expand_as semantics: wh(key) of shape (B, A) broadcasts over the
    # *batch* axis (requires B == N or B == 1), so every batch element adds the
    # same (N, Ap) term.  Implicit broadcast — no jnp.broadcast_to.
    t = jnp.tanh(v + hk_ref[...][None, :, :])                      # (TB, N, Ap) f32

    # wa projection to a single unit: VPU multiply + cross-lane reduce instead
    # of a 1-lane-wide MXU matmul.  Zero-padded wa columns contribute exactly 0.
    score = jnp.sum(t * wa_ref[...], axis=-1)                      # (TB, N) f32

    # softmax over feat_num (all f32).
    m = jnp.max(score, axis=-1, keepdims=True)
    e = jnp.exp(score - m)
    alpha = e / jnp.sum(e, axis=-1, keepdims=True)                 # (TB, N) f32

    # torch.bmm(alpha.unsqueeze(1), feats): batched MXU matmul straight off the
    # feats ref (re-read, bounded live range) — the (TB, N, Fp) alpha*feats
    # product is never materialized.
    att = jnp.einsum("tqn,tnf->tqf",
                     alpha[:, None, :].astype(feats_ref.dtype), feats_ref[...],
                     preferred_element_type=jnp.float32)           # (TB, 1, Fp) f32
    out_ref[...] = att[:, 0, :]


# --------------------------------------------------------------------------- #
# Wrapper helpers
# --------------------------------------------------------------------------- #
def _round_up(x, m):
    return ((x + m - 1) // m) * m


def _tpu_vmem_and_cores():
    """Physical VMEM bytes per core and TensorCore count (best effort)."""
    vmem = 64 << 20          # assume the smallest-VMEM generation (v7x) if unknown
    cores = 1
    try:
        info = pltpu.get_tpu_info()
        v = getattr(info, "vmem_capacity_bytes", None)
        if v:
            vmem = int(v)
        for name in ("num_cores", "tensorcore_count", "core_count"):
            c = getattr(info, name, None)
            if c:
                cores = int(c)
                break
    except Exception:
        pass
    if cores == 1:
        try:
            kind = jax.devices()[0].device_kind.lower()
            if any(s in kind for s in ("v4", "v5p", "v7", "7x")):
                cores = 2    # megacore / dual-TensorCore chips
        except Exception:
            pass
    return vmem, cores


def _default_stream_dtype():
    """bf16 feats streaming on bf16-capable VPU/EUP chips (v6e/v7x); pure f32
    elsewhere (v5e and older: no bf16 VPU/EUP, keep a single-pass f32 path)."""
    try:
        kind = jax.devices()[0].device_kind.lower()
    except Exception:
        kind = ""
    if any(s in kind for s in ("v6", "v7", "7x")):
        return jnp.bfloat16
    return jnp.float32


def _pick_batch_tile(batch, feat_num, feat_pad, att_pad, stream_itemsize,
                     vmem_budget_bytes, prefer_multi_step):
    """Largest batch tile that (a) divides B, (b) keeps the (TB, Fp) output block
    8-sublane aligned, (c) fits the VMEM budget *including* double-buffering and
    in-kernel f32 temporaries, and (d) on dual-TC chips leaves an even number of
    grid steps so both TensorCores get balanced work."""

    def est(tb):
        feats_tile = tb * feat_num * feat_pad * stream_itemsize      # one feats block
        loaded = tb * feat_num * feat_pad * 4                        # upcast feats value (worst case)
        temps = 2 * tb * feat_num * att_pad * 4                      # v + tanh temporaries (f32)
        out_tile = 2 * tb * feat_pad * 4                             # double-buffered output slab
        weights = 2 * (feat_pad * att_pad * stream_itemsize          # wvT
                       + batch * att_pad * 4                         # hk
                       + att_pad * 4)                                # wa
        return 2 * feats_tile + loaded + temps + out_tile + weights  # 2x: double-buffered input

    legal = [tb for tb in range(1, batch + 1)
             if batch % tb == 0 and (tb == batch or tb % 8 == 0)]
    candidates = [tb for tb in legal if est(tb) <= vmem_budget_bytes]
    if not candidates:
        candidates = [min(legal)]        # soft budget: fall back to the smallest legal tile
    if prefer_multi_step:
        multi = [tb for tb in candidates
                 if (batch // tb) >= 2 and (batch // tb) % 2 == 0]
        if multi:
            return max(multi)
    return max(candidates)


# --------------------------------------------------------------------------- #
# Public wrapper
# --------------------------------------------------------------------------- #
def spacial_attention(key, feats, wh_w, wh_b, wv_w, wv_b, wa_w, *, stream_dtype=None):
    """key: (B, H), feats: (B, N, F); weights in torch (out, in) layout.

    Returns (B, 1, F), matching torch.bmm(alpha.unsqueeze(1), feats).
    stream_dtype=None picks bf16 feats streaming on v6e/v7x and f32 on v5e;
    pass jnp.float32 explicitly for exact parity with the torch f32 forward.
    """
    B, H = key.shape
    Bf, N, F = feats.shape
    assert Bf == B
    A = wh_w.shape[0]

    if not (B == N or B == 1):
        # same constraint torch's expand_as((B, N, A)) imposes on a (B, A) tensor
        raise ValueError("expand_as requires batch_size == feat_num or batch_size == 1")

    if stream_dtype is None:
        stream_dtype = _default_stream_dtype()
    stream_dtype = jnp.dtype(stream_dtype)

    key = jnp.asarray(key, jnp.float32)
    feats_f32 = jnp.asarray(feats, jnp.float32)

    Ap = _round_up(A, 128)
    Fp = _round_up(F, 128)

    # Hoisted key projection with wv.bias folded in: identical additive term for
    # every grid step (expand_as broadcasts it over batch), zero-padded on the
    # attention axis so in-kernel vregs are full-lane.
    hp = jax.lax.Precision.HIGHEST
    hk = (jnp.dot(key, jnp.asarray(wh_w, jnp.float32).T, precision=hp)
          + jnp.asarray(wh_b, jnp.float32) + jnp.asarray(wv_b, jnp.float32))       # (B, A)
    hk = jnp.pad(hk, ((0, 0), (0, Ap - A)))                                        # (B, Ap)

    wvT = jnp.pad(jnp.asarray(wv_w, jnp.float32).T,
                  ((0, Fp - F), (0, Ap - A))).astype(stream_dtype)                 # (Fp, Ap)
    wa_row = jnp.pad(jnp.asarray(wa_w, jnp.float32).reshape(1, A),
                     ((0, 0), (0, Ap - A)))                                        # (1, Ap)

    # Stream feats in the (possibly bf16) MXU dtype; zero-pad feat_size so the
    # output slab is lane-dense.  This pad is a no-op for 128-aligned embed_dim
    # (the real model); otherwise it costs one XLA-side copy before the kernel.
    feats_in = feats_f32
    if Fp != F:
        feats_in = jnp.pad(feats_in, ((0, 0), (0, 0), (0, Fp - F)))
    feats_in = feats_in.astype(stream_dtype)                                       # (B, N, Fp)

    vmem_phys, cores = _tpu_vmem_and_cores()
    vmem_limit = (3 * vmem_phys) // 4              # ~48 MiB on v7x, ~96 MiB on v5e/v6e
    budget = max(vmem_limit - (4 << 20), 8 << 20)  # headroom for Mosaic internals

    TB = _pick_batch_tile(B, N, Fp, Ap, stream_dtype.itemsize, budget,
                          prefer_multi_step=(cores >= 2))
    n_tiles = B // TB

    grid_spec = pltpu.PrefetchScalarGridSpec(
        num_scalar_prefetch=0,
        grid=(n_tiles,),
        in_specs=[
            pl.BlockSpec((B, Ap), lambda t: (0, 0)),          # hk (constant block)
            pl.BlockSpec((TB, N, Fp), lambda t: (t, 0, 0)),   # batch tile of feats
            pl.BlockSpec((Fp, Ap), lambda t: (0, 0)),         # wv.weight.T
            pl.BlockSpec((1, Ap), lambda t: (0, 0)),          # wa.weight
        ],
        out_specs=pl.BlockSpec((TB, Fp), lambda t: (t, 0)),
    )

    out = pl.pallas_call(
        _spacial_attention_kernel,
        out_shape=jax.ShapeDtypeStruct((B, Fp), jnp.float32),
        grid_spec=grid_spec,
        compiler_params=pltpu.CompilerParams(
            dimension_semantics=("parallel",),
            vmem_limit_bytes=int(vmem_limit)),
    )(hk, feats_in, wvT, wa_row)

    # Lane-dense (B, Fp) slab -> (B, 1, F) torch output layout.
    return out[:, :F].reshape(B, 1, F)


# --------------------------------------------------------------------------- #
# Pure-JAX reference mirroring the PyTorch forward exactly
# --------------------------------------------------------------------------- #
def spacial_attention_reference(key, feats, wh_w, wh_b, wv_w, wv_b, wa_w):
    hp = jax.lax.Precision.HIGHEST
    v = jnp.einsum("bnf,af->bna", feats, wv_w, precision=hp) + wv_b        # wv(feats)
    hk = jnp.dot(key, wh_w.T, precision=hp) + wh_b                         # wh(key): (B, A)
    inputs = jnp.broadcast_to(hk[None, :, :], v.shape) + v                 # expand_as semantics
    score = jnp.einsum("bna,oa->bno", jnp.tanh(inputs), wa_w,
                       precision=hp)[..., 0]                               # (B, N)
    alpha = jax.nn.softmax(score, axis=1)
    att = jnp.einsum("bn,bnf->bf", alpha, feats, precision=hp)[:, None, :]  # (B, 1, F)
    return att


# --------------------------------------------------------------------------- #
# Demo / self-test
# --------------------------------------------------------------------------- #
if __name__ == "__main__":
    # In the module feat_size = hidden_size = att_size = embed_dim; batch ==
    # feat_num so the module's expand_as (and our exact reproduction of it) is
    # well defined.  A 128-aligned embed_dim keeps every block lane-dense with
    # no padding, and N % 8 == 0 keeps the in-kernel leading-dim collapse free.
    B = N = 16
    EMBED = 256
    FEAT = HID = ATT = EMBED

    root = jax.random.PRNGKey(0)
    k_key, k_feat, k_wh, k_wv, k_wa, k_b = jax.random.split(root, 6)

    key_in = jax.random.normal(k_key, (B, HID), jnp.float32)
    feats = jax.random.normal(k_feat, (B, N, FEAT), jnp.float32)

    # xavier_normal_ for weights (std = sqrt(2 / (fan_in + fan_out)))
    wh_w = jax.random.normal(k_wh, (ATT, HID), jnp.float32) * jnp.sqrt(2.0 / (ATT + HID))
    wv_w = jax.random.normal(k_wv, (ATT, FEAT), jnp.float32) * jnp.sqrt(2.0 / (ATT + FEAT))
    wa_w = jax.random.normal(k_wa, (1, ATT), jnp.float32) * jnp.sqrt(2.0 / (1 + ATT))
    # default nn.Linear bias init: U(-1/sqrt(fan_in), 1/sqrt(fan_in))
    kb1, kb2 = jax.random.split(k_b)
    wh_b = jax.random.uniform(kb1, (ATT,), jnp.float32,
                              minval=-1.0 / HID ** 0.5, maxval=1.0 / HID ** 0.5)
    wv_b = jax.random.uniform(kb2, (ATT,), jnp.float32,
                              minval=-1.0 / FEAT ** 0.5, maxval=1.0 / FEAT ** 0.5)

    ref = spacial_attention_reference(key_in, feats, wh_w, wh_b, wv_w, wv_b, wa_w)

    # 1) Pure-f32 streaming path: parity with the torch f32 forward.
    out_f32 = jax.block_until_ready(
        spacial_attention(key_in, feats, wh_w, wh_b, wv_w, wv_b, wa_w,
                          stream_dtype=jnp.float32))
    assert out_f32.shape == (B, 1, FEAT), out_f32.shape
    assert jnp.allclose(out_f32, ref, atol=1e-4, rtol=1e-4), \
        f"f32 max abs err {float(jnp.max(jnp.abs(out_f32 - ref)))}"

    # 2) bf16 feats-streaming path (v6e/v7x oriented): checked against the f32
    #    reference at bf16-appropriate tolerance (not just finiteness).
    out_bf16 = jax.block_until_ready(
        spacial_attention(key_in, feats, wh_w, wh_b, wv_w, wv_b, wa_w,
                          stream_dtype=jnp.bfloat16))
    assert out_bf16.shape == (B, 1, FEAT), out_bf16.shape
    assert jnp.allclose(out_bf16, ref, atol=5e-2, rtol=5e-2), \
        f"bf16 max abs err {float(jnp.max(jnp.abs(out_bf16 - ref)))}"

    # 3) Auto path: picks bf16 streaming on v6e/v7x, pure f32 on v5e and older.
    out_auto = jax.block_until_ready(
        spacial_attention(key_in, feats, wh_w, wh_b, wv_w, wv_b, wa_w))
    assert out_auto.shape == (B, 1, FEAT), out_auto.shape
    assert jnp.allclose(out_auto, ref, atol=5e-2, rtol=5e-2)

    print("KERNEL_OK")
</pallas_src>

<mosaic_0001>
module attributes {stable_mosaic.version = 11 : i64} {
  func.func @_spacial_attention_kernel(%arg0: i32, %arg1: memref<16x256xf32, #tpu.memory_space<vmem>>, %arg2: memref<16x16x256xf32, #tpu.memory_space<vmem>>, %arg3: memref<256x256xf32, #tpu.memory_space<vmem>>, %arg4: memref<1x256xf32, #tpu.memory_space<vmem>>, %arg5: memref<16x256xf32, #tpu.memory_space<vmem>>) attributes {dimension_semantics = [#tpu.dimension_semantics<parallel>], iteration_bounds = array<i64: 1>, scalar_prefetch = 0 : i64, scratch_operands = 0 : i64, tpu.core_type = #tpu.core_type<tc>, window_params = [{pipeline_mode = #tpu.pipeline_mode<synchronous>, transform_indices = @transform_0, window_bounds = array<i64: 16, 256>}, {transform_indices = @transform_1, window_bounds = array<i64: 16, 16, 256>}, {pipeline_mode = #tpu.pipeline_mode<synchronous>, transform_indices = @transform_2, window_bounds = array<i64: 256, 256>}, {pipeline_mode = #tpu.pipeline_mode<synchronous>, transform_indices = @transform_3, window_bounds = array<i64: 1, 256>}, {transform_indices = @transform_4, window_bounds = array<i64: 16, 256>}]} {
    %c0 = arith.constant 0 : index
    %c0_0 = arith.constant 0 : index
    %c0_1 = arith.constant 0 : index
    %0 = vector.load %arg2[%c0, %c0_0, %c0_1] : memref<16x16x256xf32, #tpu.memory_space<vmem>>, vector<16x16x256xf32>
    %1 = vector.shape_cast %0 : vector<16x16x256xf32> to vector<256x256xf32>
    %c0_2 = arith.constant 0 : index
    %c0_3 = arith.constant 0 : index
    %2 = vector.load %arg3[%c0_2, %c0_3] : memref<256x256xf32, #tpu.memory_space<vmem>>, vector<256x256xf32>
    %cst = arith.constant dense<0.000000e+00> : vector<256x256xf32>
    %3 = tpu.matmul %1, %2, %cst {dimension_numbers = #tpu.dot_dimension_numbers<[1], [0], [0], [1], [0, 0, 1, 1], [], []>} : vector<256x256xf32>, vector<256x256xf32>, vector<256x256xf32> -> vector<256x256xf32>
    %4 = vector.shape_cast %3 : vector<256x256xf32> to vector<16x16x256xf32>
    %c0_4 = arith.constant 0 : index
    %c0_5 = arith.constant 0 : index
    %5 = vector.load %arg1[%c0_4, %c0_5] : memref<16x256xf32, #tpu.memory_space<vmem>>, vector<16x256xf32>
    %6 = vector.shape_cast %5 : vector<16x256xf32> to vector<1x16x256xf32>
    %7 = vector.broadcast %6 : vector<1x16x256xf32> to vector<16x16x256xf32>
    %8 = arith.addf %4, %7 : vector<16x16x256xf32>
    %9 = math.tanh %8 : vector<16x16x256xf32>
    %c0_6 = arith.constant 0 : index
    %c0_7 = arith.constant 0 : index
    %10 = vector.load %arg4[%c0_6, %c0_7] : memref<1x256xf32, #tpu.memory_space<vmem>>, vector<1x256xf32>
    %11 = vector.shape_cast %10 : vector<1x256xf32> to vector<1x1x256xf32>
    %12 = vector.broadcast %11 : vector<1x1x256xf32> to vector<16x16x256xf32>
    %13 = arith.mulf %9, %12 : vector<16x16x256xf32>
    %cst_8 = arith.constant dense<0.000000e+00> : vector<16x16xf32>
    %14 = vector.multi_reduction <add>, %13, %cst_8 [2] : vector<16x16x256xf32> to vector<16x16xf32>
    %cst_9 = arith.constant dense<0xFF800000> : vector<16xf32>
    %15 = vector.multi_reduction <maximumf>, %14, %cst_9 [1] : vector<16x16xf32> to vector<16xf32>
    %16 = vector.shape_cast %15 : vector<16xf32> to vector<16x1xf32>
    %17 = vector.broadcast %16 : vector<16x1xf32> to vector<16x16xf32>
    %18 = arith.subf %14, %17 : vector<16x16xf32>
    %19 = math.exp %18 : vector<16x16xf32>
    %cst_10 = arith.constant dense<0.000000e+00> : vector<16xf32>
    %20 = vector.multi_reduction <add>, %19, %cst_10 [1] : vector<16x16xf32> to vector<16xf32>
    %21 = vector.shape_cast %20 : vector<16xf32> to vector<16x1xf32>
    %22 = vector.broadcast %21 : vector<16x1xf32> to vector<16x16xf32>
    %23 = arith.divf %19, %22 : vector<16x16xf32>
    %24 = vector.shape_cast %23 : vector<16x16xf32> to vector<16x1x16xf32>
    %c0_11 = arith.constant 0 : index
    %c0_12 = arith.constant 0 : index
    %c0_13 = arith.constant 0 : index
    %25 = vector.load %arg2[%c0_11, %c0_12, %c0_13] : memref<16x16x256xf32, #tpu.memory_space<vmem>>, vector<16x16x256xf32>
    "tpu.trace_start"() <{level = 10 : i32, message = "tqn,tnf->tqf"}> : () -> ()
    %cst_14 = arith.constant dense<0.000000e+00> : vector<16x1x256xf32>
    %26 = tpu.matmul %24, %25, %cst_14 {dimension_numbers = #tpu.dot_dimension_numbers<[2], [1], [1], [2], [0, 0, 0, 1, 1, 2], [0], [0]>} : vector<16x1x16xf32>, vector<16x16x256xf32>, vector<16x1x256xf32> -> vector<16x1x256xf32>
    "tpu.trace_stop"() : () -> ()
    %27 = vector.shape_cast %26 : vector<16x1x256xf32> to vector<16x256xf32>
    %c0_15 = arith.constant 0 : index
    %c0_16 = arith.constant 0 : index
    %28 = vector.load %arg5[%c0_15, %c0_16] : memref<16x256xf32, #tpu.memory_space<vmem>>, vector<16x256xf32>
    tpu.vector_store %arg5[%c0_15, %c0_16], %27 {strides = array<i32>} : memref<16x256xf32, #tpu.memory_space<vmem>>, vector<16x256xf32>,
    return
  }
  func.func @transform_0(%arg0: i32) -> (i32, i32) {
    %c0_i32 = arith.constant 0 : i32
    %c0_i32_0 = arith.constant 0 : i32
    %c0_i32_1 = arith.constant 0 : i32
    return %c0_i32, %c0_i32_0 : i32, i32
  }
  func.func @transform_1(%arg0: i32) -> (i32, i32, i32) {
    %c0_i32 = arith.constant 0 : i32
    %c0_i32_0 = arith.constant 0 : i32
    %c0_i32_1 = arith.constant 0 : i32
    return %arg0, %c0_i32, %c0_i32_0 : i32, i32, i32
  }
  func.func @transform_2(%arg0: i32) -> (i32, i32) {
    %c0_i32 = arith.constant 0 : i32
    %c0_i32_0 = arith.constant 0 : i32
    %c0_i32_1 = arith.constant 0 : i32
    return %c0_i32, %c0_i32_0 : i32, i32
  }
  func.func @transform_3(%arg0: i32) -> (i32, i32) {
    %c0_i32 = arith.constant 0 : i32
    %c0_i32_0 = arith.constant 0 : i32
    %c0_i32_1 = arith.constant 0 : i32
    return %c0_i32, %c0_i32_0 : i32, i32
  }
  func.func @transform_4(%arg0: i32) -> (i32, i32) {
    %c0_i32 = arith.constant 0 : i32
    %c0_i32_0 = arith.constant 0 : i32
    return %arg0, %c0_i32 : i32, i32
  }
}

</mosaic_0001>

<bundles_post_ra>
// kernel: tpu_custom_call.1
= control target key start
LH: loop header
LB: loop body
LE: loop exit
PB: predicated region body
PF: predicated region fallthrough
CT: control target
= control target key end

     0   :  { %9 = vsyncpa [#allocation3], 0  ;;  %s4614_s0 = inlined_call_operand.hbm [shape: f32[16,256], index: 0, kind: input, shape index: {}]   ;;  %s4615_s1 = inlined_call_operand.hbm [shape: f32[16,16,256], index: 1, kind: input, shape index: {}]   ;;  %s4616_s2 = inlined_call_operand.hbm [shape: f32[256,256], index: 2, kind: input, shape index: {}]   ;;  %s4617_s3 = inlined_call_operand.vmem [shape: f32[1,256], index: 3, kind: input, shape index: {}]   ;;  %s4618_s4 = inlined_call_operand.hbm [shape: f32[16,256], index: 4, kind: output, shape index: {}]  }
   0x1   :  { %10 = vsyncpa [#allocation6], 0 }
   0x2   :  { %11 = vsyncpa [#allocation4], 0  ;;  %s3654_s15 = smov [#allocation5]   ;;  %s3655_s17 = smov [#allocation2]  }
   0x3   :  { %s29_s16 = sshll.u32 %s3654_s15, 4  ;;  %s17_s18 = sshll.u32 %s3655_s17, 4  ;;  %s30_s16 = int_to_ptr.vmem [resolvable:$true] %s29_s16  ;;  %s3687_s18 = int_to_ptr.vmem [resolvable:$true] %s17_s18 }
   0x4   :  { %s3560_s21 = scalar_lea.hbm %s4615_s1, 8192 }
   0x5   :  { %p3561_p0 = scmp.ne.s32.totalorder %s4615_s1, %s3560_s21  ;;  %p3564_p1 = scmp.lt.u32.totalorder %s3560_s21, %s4615_s1 }
   0x7   :  { %p3566_p2 = pnand %p3564_p1, %p3561_p0 }
   0x9   :  { %3569 = shalt.err (!%p3566_p2)
}
   0xa   :  { %s3570_s26 = scalar_lea.vmem %s30_s16, 8192  ;;  %p3575_p4 = scmp.lt.s32.totalorder %s30_s16, %s30_s16 }
   0xb   :  { %p3571_p3 = scmp.ne.s32.totalorder %s30_s16, %s3570_s26  ;;  %p3576_p5 = scmp.lt.s32.totalorder %s3570_s26, %s3570_s26 }
   0xd   :  { %p3577_p6 = por %p3576_p5, %p3575_p4 }
   0xf   :  { %p3578_p7 = pnand %p3577_p6, %p3571_p3 }
  0x11   :  { %3581 = shalt.err (!%p3578_p7)
}
  0x12   :  { %s3656_s27 = smov 256   ;;  %s3657_s28 = smov 16  }
  0x13   :  { %35 = dma.hbm_to_vmem [thread:$0]  %s4615_s1, 8192, %s30_s16, [#allocation6], %s3656_s27, %s3656_s27, %s3657_s28  }
  0x14   :  { %s3582_s7 = scalar_lea.hbm %s4614_s0, 512 }
  0x15   :  { %p3583_p8 = scmp.ne.s32.totalorder %s4614_s0, %s3582_s7  ;;  %p3586_p9 = scmp.lt.u32.totalorder %s3582_s7, %s4614_s0 }
  0x17   :  { %p3588_p10 = pnand %p3586_p9, %p3583_p8 }
  0x19   :  { %3591 = shalt.err (!%p3588_p10)
}
  0x1a   :  { %s3592_s12 = scalar_lea.vmem %s3687_s18, 512  ;;  %p3597_p12 = scmp.lt.s32.totalorder %s3687_s18, %s3687_s18 }
  0x1b   :  { %p3593_p11 = scmp.ne.s32.totalorder %s3687_s18, %s3592_s12  ;;  %p3598_p13 = scmp.lt.s32.totalorder %s3592_s12, %s3592_s12 }
  0x1d   :  { %p3599_p0 = por %p3598_p13, %p3597_p12 }
  0x1f   :  { %p3600_p1 = pnand %p3599_p0, %p3593_p11 }
  0x21   :  { %3603 = shalt.err (!%p3600_p1)
}
  0x22   :  { %23 = dma.hbm_to_vmem [thread:$0]  %s4614_s0, 512, %s3687_s18, [#allocation3], %s3656_s27, %s3656_s27, %s3657_s28  }
  0x23   :  { %s3658_s14 = smov [#allocation7]   ;;  %s3604_s19 = scalar_lea.hbm %s4616_s2, 8192 }
  0x24   :  { %s41_s15 = sshll.u32 %s3658_s14, 4  ;;  %p3605_p2 = scmp.ne.s32.totalorder %s4616_s2, %s3604_s19  ;;  %s42_s15 = int_to_ptr.vmem [resolvable:$true] %s41_s15 }
  0x25   :  { %p3608_p3 = scmp.lt.u32.totalorder %s3604_s19, %s4616_s2 }
  0x27   :  { %p3610_p4 = pnand %p3608_p3, %p3605_p2 }
  0x29   :  { %3613 = shalt.err (!%p3610_p4)
}
  0x2a   :  { %s3614_s24 = scalar_lea.vmem %s42_s15, 8192  ;;  %p3619_p6 = scmp.lt.s32.totalorder %s42_s15, %s42_s15 }
  0x2b   :  { %p3615_p5 = scmp.ne.s32.totalorder %s42_s15, %s3614_s24  ;;  %p3620_p7 = scmp.lt.s32.totalorder %s3614_s24, %s3614_s24 }
  0x2d   :  { %p3621_p8 = por %p3620_p7, %p3619_p6 }
  0x2f   :  { %p3622_p9 = pnand %p3621_p8, %p3615_p5 }
  0x31   :  { %3625 = shalt.err (!%p3622_p9)
}
  0x32   :  { %47 = dma.hbm_to_vmem [thread:$0]  %s4616_s2, 8192, %s42_s15, [#allocation6], %s3656_s27, %s3656_s27, %s3657_s28  }
  0x33   :  { %3648 = dma.done.wait [#allocation3], 512  }
  0x34   :  { %3649 = vsyncadd [#allocation3], 4294966784 }
  0x35   :  { %3650 = dma.done.wait [#allocation6], 16384  }
  0x36   :  { %3651 = vsyncadd [#allocation6], 4294950912  ;;  %v124_v0 = vld [vmem:[#allocation7 + $0x8] sm:$0xff]  ;;  %v126_v1 = vld [vmem:[#allocation7 + $0x18] sm:$0xff]  ;;  %vm791_vm0 = vcmask 130112   ;;  %vm928_vm1 = vcmask 1041409  }
  0x37   :  { %v123_v2 = vld [vmem:[#allocation7] sm:$0xff]  ;;  %v3130_v3 = vpack.c.bf16 %v126_v1, %v124_v0  ;;  %v125_v4 = vld [vmem:[#allocation7 + $0x10] sm:$0xff]  ;;  %v128_v5 = vld [vmem:[#allocation7 + $0x28] sm:$0xff]  ;;  %vm930_vm2 = vcmask 1042434   ;;  %vm932_vm3 = vcmask 1043459   ;;  %vm934_vm4 = vcmask 1044484  }
  0x38   :  { %v130_v6 = vld [vmem:[#allocation7 + $0x38] sm:$0xff]  ;;  %v3132_v7 = vpack.c.bf16 %v125_v4, %v123_v2  ;;  %v127_v9 = vld [vmem:[#allocation7 + $0x20] sm:$0xff]  ;;  %v129_v10 = vld [vmem:[#allocation7 + $0x30] sm:$0xff]  ;;  %vm936_vm5 = vcmask 1045509   ;;  %vm938_vm6 = vcmask 1046534   ;;  %vm940_vm7 = vcmask 1047559  }
  0x39   :  { %v3134_v8 = vpack.c.bf16 %v130_v6, %v128_v5  ;;  %v132_v11 = vld [vmem:[#allocation7 + $0x48] sm:$0xff]  ;;  %3131 = vmatprep.subr.bf16.mxu0 %v3130_v3  ;;  %v134_v12 = vld [vmem:[#allocation7 + $0x58] sm:$0xff]  ;;  %3258 = vmatprep.subr.bf16.mxu1 %v3130_v3  ;;  %v3136_v13 = vpack.c.bf16 %v129_v10, %v127_v9  ;;  %v131_v15 = vld [vmem:[#allocation7 + $0x40] sm:$0xff]  ;;  %vm951_vm8 = vcmask 130048  }
  0x3a   :  { %3133 = vmatpush1.bf16.msra.mxu0 %v3132_v7  ;;  %3274 = vmatpush1.bf16.msra.mxu1 %v3132_v7  ;;  %v3138_v14 = vpack.c.bf16 %v134_v12, %v132_v11  ;;  %v133_v16 = vld [vmem:[#allocation7 + $0x50] sm:$0xff]  ;;  %v136_v17 = vld [vmem:[#allocation7 + $0x68] sm:$0xff]  ;;  %v138_v18 = vld [vmem:[#allocation7 + $0x78] sm:$0xff] }
  0x3b   :  { %3135 = vmatprep.subr.bf16.mxu0 %v3134_v8  ;;  %3259 = vmatprep.subr.bf16.mxu1 %v3134_v8  ;;  %v3140_v19 = vpack.c.bf16 %v133_v16, %v131_v15  ;;  %v3142_v20 = vpack.c.bf16 %v138_v18, %v136_v17  ;;  %v135_v21 = vld [vmem:[#allocation7 + $0x60] sm:$0xff]  ;;  %v137_v22 = vld [vmem:[#allocation7 + $0x70] sm:$0xff]  ;;  %v140_v23 = vld [vmem:[#allocation7 + $0x88] sm:$0xff] }
  0x3c   :  { %v142_v24 = vld [vmem:[#allocation7 + $0x98] sm:$0xff]  ;;  %v3144_v25 = vpack.c.bf16 %v137_v22, %v135_v21  ;;  %v139_v27 = vld [vmem:[#allocation7 + $0x80] sm:$0xff]  ;;  %v141_v28 = vld [vmem:[#allocation7 + $0x90] sm:$0xff] }
  0x3d   :  { %v3146_v26 = vpack.c.bf16 %v142_v24, %v140_v23  ;;  %v144_v29 = vld [vmem:[#allocation7 + $0xa8] sm:$0xff]  ;;  %v146_v30 = vld [vmem:[#allocation7 + $0xb8] sm:$0xff]  ;;  %v3148_v31 = vpack.c.bf16 %v141_v28, %v139_v27  ;;  %v143_v33 = vld [vmem:[#allocation7 + $0xa0] sm:$0xff] }
  0x3e   :  { %3137 = vmatpush1.bf16.msra.mxu0 %v3136_v13  ;;  %3275 = vmatpush1.bf16.msra.mxu1 %v3136_v13  ;;  %v3150_v32 = vpack.c.bf16 %v146_v30, %v144_v29  ;;  %v145_v34 = vld [vmem:[#allocation7 + $0xb0] sm:$0xff]  ;;  %v148_v35 = vld [vmem:[#allocation7 + $0xc8] sm:$0xff]  ;;  %v150_v36 = vld [vmem:[#allocation7 + $0xd8] sm:$0xff] }
  0x3f   :  { %3139 = vmatprep.subr.bf16.mxu0 %v3138_v14  ;;  %3260 = vmatprep.subr.bf16.mxu1 %v3138_v14  ;;  %v3152_v37 = vpack.c.bf16 %v145_v34, %v143_v33  ;;  %v3154_v38 = vpack.c.bf16 %v150_v36, %v148_v35  ;;  %v147_v39 = vld [vmem:[#allocation7 + $0xc0] sm:$0xff]  ;;  %v149_v40 = vld [vmem:[#allocation7 + $0xd0] sm:$0xff]  ;;  %v3739_v41 = vld [vmem:[#allocation5 + $0x8] sm:$0xff] }
  0x40   :  { %v152_v42 = vld [vmem:[#allocation7 + $0xe8] sm:$0xff]  ;;  %v154_v43 = vld [vmem:[#allocation7 + $0xf8] sm:$0xff]  ;;  %251 = vmatprep.mubr.f32.mxu0 %v3739_v41  ;;  %v3742_v44 = vld [vmem:[#allocation5 + $0x20] sm:$0xff]  ;;  %v3156_v46 = vpack.c.bf16 %v149_v40, %v147_v39 }
  0x41   :  { %4644 = vst [vmem:[#allocation12_spill] sm:$0xff] %v3742_v44  ;;  %v3744_v45 = vld [vmem:[#allocation5 + $0x30] sm:$0xff]  ;;  %v151_v47 = vld [vmem:[#allocation7 + $0xe0] sm:$0xff]  ;;  %v3748_v49 = vld [vmem:[#allocation5 + $0x48] sm:$0xff]  ;;  %v3158_v51 = vpack.c.bf16 %v154_v43, %v152_v42 }
  0x42   :  { %3141 = vmatpush1.bf16.msra.mxu0 %v3140_v19  ;;  %3276 = vmatpush1.bf16.msra.mxu1 %v3140_v19  ;;  %4645 = vst [vmem:[#allocation13_spill] sm:$0xff] %v3744_v45  ;;  %4646 = vst [vmem:[#allocation14_spill] sm:$0xff] %v3748_v49  ;;  %v3750_v50 = vld [vmem:[#allocation5 + $0x58] sm:$0xff]  ;;  %v153_v52 = vld [vmem:[#allocation7 + $0xf0] sm:$0xff] }
  0x43   :  { %3143 = vmatprep.subr.bf16.mxu0 %v3142_v20  ;;  %3261 = vmatprep.subr.bf16.mxu1 %v3142_v20  ;;  %4647 = vst [vmem:[#allocation15_spill] sm:$0xff] %v3750_v50  ;;  %v3752_v53 = vld [vmem:[#allocation5 + $0x40] sm:$0xff]  ;;  %v3756_v55 = vld [vmem:[#allocation5 + $0x50] sm:$0xff]  ;;  %v156_v56 = vld [vmem:[#allocation7 + $0x108] sm:$0xff]  ;;  %v3160_v59 = vpack.c.bf16 %v153_v52, %v151_v47 }
  0x44   :  { %4648 = vst [vmem:[#allocation16_spill] sm:$0xff] %v3752_v53  ;;  %4649 = vst [vmem:[#allocation17_spill] sm:$0xff] %v3756_v55  ;;  %v158_v57 = vld [vmem:[#allocation7 + $0x118] sm:$0xff]  ;;  %v155_v61 = vld [vmem:[#allocation7 + $0x100] sm:$0xff] }
  0x45   :  { %v3162_v60 = vpack.c.bf16 %v158_v57, %v156_v56  ;;  %v157_v62 = vld [vmem:[#allocation7 + $0x110] sm:$0xff]  ;;  %v160_v63 = vld [vmem:[#allocation7 + $0x128] sm:$0xff]  ;;  %v162_v0 = vld [vmem:[#allocation7 + $0x138] sm:$0xff] }
  0x46   :  { %3145 = vmatpush1.bf16.msra.mxu0 %v3144_v25  ;;  %3277 = vmatpush1.bf16.msra.mxu1 %v3144_v25  ;;  %v3760_v1 = vld [vmem:[#allocation5 + $0x188] sm:$0xff]  ;;  %v3762_v2 = vld [vmem:[#allocation5 + $0x198] sm:$0xff]  ;;  %v3164_v4 = vpack.c.bf16 %v157_v62, %v155_v61  ;;  %v3767_v5 = vld [vmem:[#allocation5 + $0x180] sm:$0xff]  ;;  %v3166_v7 = vpack.c.bf16 %v162_v0, %v160_v63 }
  0x47   :  { %3147 = vmatprep.subr.bf16.mxu0 %v3146_v26  ;;  %3262 = vmatprep.subr.bf16.mxu1 %v3146_v26  ;;  %4650 = vst [vmem:[#allocation18_spill] sm:$0xff] %v3760_v1  ;;  %4651 = vst [vmem:[#allocation19_spill] sm:$0xff] %v3762_v2  ;;  %v3769_v6 = vld [vmem:[#allocation5 + $0x190] sm:$0xff]  ;;  %v159_v8 = vld [vmem:[#allocation7 + $0x120] sm:$0xff] }
  0x48   :  { %395 = vmatprep.mubr.f32.mxu1 %v3760_v1  ;;  %4652 = vst [vmem:[#allocation20_spill] sm:$0xff] %v3767_v5  ;;  %4653 = vst [vmem:[#allocation21_spill] sm:$0xff] %v3769_v6  ;;  %v161_v9 = vld [vmem:[#allocation7 + $0x130] sm:$0xff]  ;;  %v164_v10 = vld [vmem:[#allocation7 + $0x148] sm:$0xff] }
  0x49   :  { %v166_v12 = vld [vmem:[#allocation7 + $0x158] sm:$0xff]  ;;  %v3773_v13 = vld [vmem:[#allocation5 + $0x1a8] sm:$0xff]  ;;  %v3777_v15 = vld [vmem:[#allocation5 + $0x1a0] sm:$0xff]  ;;  %v3168_v18 = vpack.c.bf16 %v161_v9, %v159_v8 }
  0x4a   :  { %3149 = vmatpush1.bf16.msra.mxu0 %v3148_v31  ;;  %3278 = vmatpush1.bf16.msra.mxu1 %v3148_v31  ;;  %4654 = vst [vmem:[#allocation22_spill] sm:$0xff] %v3773_v13  ;;  %v3775_v14 = vld [vmem:[#allocation5 + $0x1b8] sm:$0xff]  ;;  %4656 = vst [vmem:[#allocation24_spill] sm:$0xff] %v3777_v15  ;;  %v3781_v17 = vld [vmem:[#allocation5 + $0x1b0] sm:$0xff]  ;;  %v3170_v23 = vpack.c.bf16 %v166_v12, %v164_v10 }
  0x4b   :  { %3151 = vmatprep.subr.bf16.mxu0 %v3150_v32  ;;  %3263 = vmatprep.subr.bf16.mxu1 %v3150_v32  ;;  %4655 = vst [vmem:[#allocation23_spill] sm:$0xff] %v3775_v14  ;;  %4657 = vst [vmem:[#allocation25_spill] sm:$0xff] %v3781_v17  ;;  %v163_v19 = vld [vmem:[#allocation7 + $0x140] sm:$0xff]  ;;  %v165_v20 = vld [vmem:[#allocation7 + $0x150] sm:$0xff] }
  0x4c   :  { %v3785_v22 = vld [vmem:[#allocation5 + $0x1c8] sm:$0xff]  ;;  %v3787_v24 = vld [vmem:[#allocation5 + $0x1c0] sm:$0xff]  ;;  %v3789_v25 = vld [vmem:[#allocation5 + $0x1d8] sm:$0xff]  ;;  %v3172_v31 = vpack.c.bf16 %v165_v20, %v163_v19 }
  0x4d   :  { %4658 = vst [vmem:[#allocation26_spill] sm:$0xff] %v3785_v22  ;;  %4659 = vst [vmem:[#allocation27_spill] sm:$0xff] %v3787_v24  ;;  %v3791_v26 = vld [vmem:[#allocation5 + $0x1d0] sm:$0xff]  ;;  %v168_v27 = vld [vmem:[#allocation7 + $0x168] sm:$0xff] }
  0x4e   :  { %3153 = vmatpush1.bf16.msra.mxu0 %v3152_v37  ;;  %3279 = vmatpush1.bf16.msra.mxu1 %v3152_v37  ;;  %4660 = vst [vmem:[#allocation28_spill] sm:$0xff] %v3789_v25  ;;  %4661 = vst [vmem:[#allocation29_spill] sm:$0xff] %v3791_v26  ;;  %v170_v28 = vld [vmem:[#allocation7 + $0x178] sm:$0xff]  ;;  %v167_v32 = vld [vmem:[#allocation7 + $0x160] sm:$0xff] }
  0x4f   :  { %3155 = vmatprep.subr.bf16.mxu0 %v3154_v38  ;;  %3264 = vmatprep.subr.bf16.mxu1 %v3154_v38  ;;  %v169_v33 = vld [vmem:[#allocation7 + $0x170] sm:$0xff]  ;;  %v3174_v34 = vpack.c.bf16 %v170_v28, %v168_v27  ;;  %v172_v35 = vld [vmem:[#allocation7 + $0x188] sm:$0xff]  ;;  %v174_v36 = vld [vmem:[#allocation7 + $0x198] sm:$0xff] }
  0x50   :  { %v3797_v37 = vld [vmem:[#allocation5 + $0x1e8] sm:$0xff]  ;;  %v3799_v38 = vld [vmem:[#allocation5 + $0x1e0] sm:$0xff]  ;;  %v3801_v39 = vld [vmem:[#allocation5 + $0x1f8] sm:$0xff]  ;;  %v3178_v47 = vpack.c.bf16 %v174_v36, %v172_v35 }
  0x51   :  { %4662 = vst [vmem:[#allocation30_spill] sm:$0xff] %v3797_v37  ;;  %4663 = vst [vmem:[#allocation31_spill] sm:$0xff] %v3799_v38  ;;  %v3803_v40 = vld [vmem:[#allocation5 + $0x1f0] sm:$0xff]  ;;  %v176_v56 = vld [vmem:[#allocation7 + $0x1a8] sm:$0xff] }
  0x52   :  { %3157 = vmatpush1.bf16.msra.mxu0 %v3156_v46  ;;  %3280 = vmatpush1.bf16.msra.mxu1 %v3156_v46  ;;  %4664 = vst [vmem:[#allocation32_spill] sm:$0xff] %v3801_v39  ;;  %4665 = vst [vmem:[#allocation33_spill] sm:$0xff] %v3803_v40  ;;  %v3176_v46 = vpack.c.bf16 %v169_v33, %v167_v32  ;;  %v173_v52 = vld [vmem:[#allocation7 + $0x190] sm:$0xff]  ;;  %v178_v57 = vld [vmem:[#allocation7 + $0x1b8] sm:$0xff] }
  0x53   :  { %3159 = vmatprep.subr.bf16.mxu0 %v3158_v51  ;;  %3265 = vmatprep.subr.bf16.mxu1 %v3158_v51  ;;  %v171_v51 = vld [vmem:[#allocation7 + $0x180] sm:$0xff]  ;;  %v177_v62 = vld [vmem:[#allocation7 + $0x1b0] sm:$0xff]  ;;  %v180_v63 = vld [vmem:[#allocation7 + $0x1c8] sm:$0xff] }
  0x54   :  { %v175_v61 = vld [vmem:[#allocation7 + $0x1a0] sm:$0xff]  ;;  %v182_v0 = vld [vmem:[#allocation7 + $0x1d8] sm:$0xff]  ;;  %v181_v9 = vld [vmem:[#allocation7 + $0x1d0] sm:$0xff] }
  0x55   :  { %v179_v8 = vld [vmem:[#allocation7 + $0x1c0] sm:$0xff]  ;;  %v184_v10 = vld [vmem:[#allocation7 + $0x1e8] sm:$0xff]  ;;  %v186_v12 = vld [vmem:[#allocation7 + $0x1f8] sm:$0xff] }
  0x56   :  { %3161 = vmatpush1.bf16.msra.mxu0 %v3160_v59  ;;  %3281 = vmatpush1.bf16.msra.mxu1 %v3160_v59  ;;  %v3180_v59 = vpack.c.bf16 %v173_v52, %v171_v51  ;;  %v3190_v19 = vpack.c.bf16 %v186_v12, %v184_v10  ;;  %v183_v20 = vld [vmem:[#allocation7 + $0x1e0] sm:$0xff]  ;;  %v62_v28 = vld [vmem:[#allocation5 + $0x18] sm:$0xff]  ;;  %v61_v33 = vld [vmem:[#allocation5 + $0x10] sm:$0xff] }
  0x57   :  { %3163 = vmatprep.subr.bf16.mxu0 %v3162_v60  ;;  %3266 = vmatprep.subr.bf16.mxu1 %v3162_v60  ;;  %v3182_v60 = vpack.c.bf16 %v178_v57, %v176_v56  ;;  %v59_v32 = vld [vmem:[#allocation5] sm:$0xff]  ;;  %v64_v35 = vld [vmem:[#allocation5 + $0x28] sm:$0xff]  ;;  %v66_v36 = vld [vmem:[#allocation5 + $0x38] sm:$0xff] }
  0x58   :  { %v74_v51 = vld [vmem:[#allocation5 + $0x78] sm:$0xff]  ;;  %v73_v52 = vld [vmem:[#allocation5 + $0x70] sm:$0xff]  ;;  %v76_v56 = vld [vmem:[#allocation5 + $0x88] sm:$0xff] }
  0x59   :  { %v75_v57 = vld [vmem:[#allocation5 + $0x80] sm:$0xff]  ;;  %v88_v10 = vld [vmem:[#allocation5 + $0xe8] sm:$0xff] }
  0x5a   :  { %3165 = vmatpush1.bf16.msra.mxu0 %v3164_v4  ;;  %3282 = vmatpush1.bf16.msra.mxu1 %v3164_v4  ;;  %v3184_v4 = vpack.c.bf16 %v177_v62, %v175_v61  ;;  %v80_v61 = vld [vmem:[#allocation5 + $0xa8] sm:$0xff]  ;;  %v79_v62 = vld [vmem:[#allocation5 + $0xa0] sm:$0xff] }
  0x5b   :  { %3167 = vmatprep.subr.bf16.mxu0 %v3166_v7  ;;  %3267 = vmatprep.subr.bf16.mxu1 %v3166_v7  ;;  %v3186_v7 = vpack.c.bf16 %v182_v0, %v180_v63  ;;  %v82_v63 = vld [vmem:[#allocation5 + $0xb8] sm:$0xff]  ;;  %v81_v0 = vld [vmem:[#allocation5 + $0xb0] sm:$0xff]  ;;  %v87_v12 = vld [vmem:[#allocation5 + $0xe0] sm:$0xff] }
  0x5e   :  { %3169 = vmatpush1.bf16.msra.mxu0 %v3168_v18  ;;  %3283 = vmatpush1.bf16.msra.mxu1 %v3168_v18  ;;  %v3188_v18 = vpack.c.bf16 %v181_v9, %v179_v8  ;;  %v86_v8 = vld [vmem:[#allocation5 + $0xd8] sm:$0xff]  ;;  %v85_v9 = vld [vmem:[#allocation5 + $0xd0] sm:$0xff] }
  0x5f   :  { %3171 = vmatprep.subr.bf16.mxu0 %v3170_v23  ;;  %3268 = vmatprep.subr.bf16.mxu1 %v3170_v23  ;;  %v185_v23 = vld [vmem:[#allocation7 + $0x1f0] sm:$0xff] }
  0x60   :  { %v3192_v27 = vpack.c.bf16 %v185_v23, %v183_v20  ;;  %v92_v20 = vld [vmem:[#allocation5 + $0x108] sm:$0xff]  ;;  %v91_v23 = vld [vmem:[#allocation5 + $0x100] sm:$0xff] }
  0x62   :  { %3173 = vmatpush1.bf16.msra.mxu0 %v3172_v31  ;;  %3284 = vmatpush1.bf16.msra.mxu1 %v3172_v31  ;;  %v3194_v31 = vpack.c.bf16 %v62_v28, %v3739_v41  ;;  %v72_v41 = vld [vmem:[#allocation5 + $0x68] sm:$0xff] }
  0x63   :  { %3175 = vmatprep.subr.bf16.mxu0 %v3174_v34  ;;  %3269 = vmatprep.subr.bf16.mxu1 %v3174_v34  ;;  %v3196_v34 = vpack.c.bf16 %v61_v33, %v59_v32 }
  0x66   :  { %3177 = vmatpush1.bf16.msra.mxu0 %v3176_v46  ;;  %3285 = vmatpush1.bf16.msra.mxu1 %v3176_v46  ;;  %v3198_v46 = vpack.c.bf16 %v66_v36, %v64_v35 }
  0x67   :  { %3179 = vmatprep.subr.bf16.mxu0 %v3178_v47  ;;  %3270 = vmatprep.subr.bf16.mxu1 %v3178_v47  ;;  %v71_v47 = vld [vmem:[#allocation5 + $0x60] sm:$0xff] }
  0x6a   :  { %3181 = vmatpush1.bf16.msra.mxu0 %v3180_v59  ;;  %3286 = vmatpush1.bf16.msra.mxu1 %v3180_v59  ;;  %v78_v59 = vld [vmem:[#allocation5 + $0x98] sm:$0xff] }
  0x6b   :  { %3183 = vmatprep.subr.bf16.mxu0 %v3182_v60  ;;  %3271 = vmatprep.subr.bf16.mxu1 %v3182_v60  ;;  %v77_v60 = vld [vmem:[#allocation5 + $0x90] sm:$0xff] }
  0x6e   :  { %3185 = vmatpush1.bf16.msra.mxu0 %v3184_v4  ;;  %3287 = vmatpush1.bf16.msra.mxu1 %v3184_v4  ;;  %v84_v4 = vld [vmem:[#allocation5 + $0xc8] sm:$0xff] }
  0x6f   :  { %3187 = vmatprep.subr.bf16.mxu0 %v3186_v7  ;;  %3272 = vmatprep.subr.bf16.mxu1 %v3186_v7  ;;  %v83_v7 = vld [vmem:[#allocation5 + $0xc0] sm:$0xff] }
  0x72   :  { %3189 = vmatpush1.bf16.msra.mxu0 %v3188_v18  ;;  %3288 = vmatpush1.bf16.msra.mxu1 %v3188_v18  ;;  %v90_v18 = vld [vmem:[#allocation5 + $0xf8] sm:$0xff] }
  0x73   :  { %3191 = vmatprep.subr.bf16.mxu0 %v3190_v19  ;;  %3273 = vmatprep.subr.bf16.mxu1 %v3190_v19  ;;  %v89_v19 = vld [vmem:[#allocation5 + $0xf0] sm:$0xff] }
  0x76   :  { %3193 = vmatpush1.bf16.msra.mxu0 %v3192_v27  ;;  %3289 = vmatpush1.bf16.msra.mxu1 %v3192_v27  ;;  %v94_v27 = vld [vmem:[#allocation5 + $0x118] sm:$0xff] }
  0x77   :  { %3195 = vmatprep.subr.bf16.mxu1 %v3194_v31  ;;  %v96_v31 = vld [vmem:[#allocation5 + $0x128] sm:$0xff] }
  0x79   :  { %252 = vmatmul.mubr.f32.vlgmr.msra.gmra.mrb[0].mxu0 %v59_v32  ;;  %396 = vmatmul.mubr.f32.vlgmr.msra.gmra.mrb[0].mxu1 %v3767_v5  ;;  %v95_v32 = vld [vmem:[#allocation5 + $0x120] sm:$0xff] }
  0x7a   :  { %257 = vmatprep.mubr.f32.mxu0 %v62_v28  ;;  %401 = vmatprep.mubr.f32.mxu1 %v3762_v2  ;;  %v93_v28 = vld [vmem:[#allocation5 + $0x110] sm:$0xff] }
  0x7b   :  { %3197 = vmatpush1.bf16.msra.mxu1 %v3196_v34  ;;  %v97_v34 = vld [vmem:[#allocation5 + $0x130] sm:$0xff] }
  0x7c   :  { %3199 = vmatprep.subr.bf16.mxu1 %v3198_v46  ;;  %v102_v46 = vld [vmem:[#allocation5 + $0x158] sm:$0xff] }
  0x7d   :  { %258 = vmatmul.mubr.f32.gmra.mrb[2].mxu0 %v61_v33  ;;  %402 = vmatmul.mubr.f32.gmra.mrb[2].mxu1 %v3769_v6  ;;  %v98_v33 = vld [vmem:[#allocation5 + $0x138] sm:$0xff] }
  0x7e   :  { %263 = vmatprep.mubr.f32.mxu0 %v64_v35  ;;  %407 = vmatprep.mubr.f32.mxu1 %v3773_v13  ;;  %v100_v35 = vld [vmem:[#allocation5 + $0x148] sm:$0xff] }
  0x81   :  { %264 = vmatmul.mubr.f32.gmra.mrb[4].mxu0 %v3742_v44  ;;  %408 = vmatmul.mubr.f32.gmra.mrb[4].mxu1 %v3777_v15 }
  0x82   :  { %269 = vmatprep.mubr.f32.mxu0 %v66_v36  ;;  %413 = vmatprep.mubr.f32.mxu1 %v3775_v14  ;;  %v99_v36 = vld [vmem:[#allocation5 + $0x140] sm:$0xff] }
  0x85   :  { %270 = vmatmul.mubr.f32.gmra.mrb[6].mxu0 %v3744_v45  ;;  %414 = vmatmul.mubr.f32.gmra.mrb[6].mxu1 %v3781_v17 }
  0x86   :  { %275 = vmatprep.mubr.f32.mxu0 %v3748_v49  ;;  %419 = vmatprep.mubr.f32.mxu1 %v3785_v22 }
  0x89   :  { %276 = vmatmul.mubr.f32.gmra.mrb[8].mxu0 %v3752_v53  ;;  %420 = vmatmul.mubr.f32.gmra.mrb[8].mxu1 %v3787_v24 }
  0x8a   :  { %281 = vmatprep.mubr.f32.mxu0 %v3750_v50  ;;  %425 = vmatprep.mubr.f32.mxu1 %v3789_v25 }
  0x8d   :  { %282 = vmatmul.mubr.f32.gmra.mrb[10].mxu0 %v3756_v55  ;;  %426 = vmatmul.mubr.f32.gmra.mrb[10].mxu1 %v3791_v26 }
  0x8e   :  { %287 = vmatprep.mubr.f32.mxu0 %v72_v41  ;;  %431 = vmatprep.mubr.f32.mxu1 %v3797_v37  ;;  %v101_v41 = vld [vmem:[#allocation5 + $0x150] sm:$0xff] }
  0x91   :  { %288 = vmatmul.mubr.f32.gmra.mrb[12].mxu0 %v71_v47  ;;  %432 = vmatmul.mubr.f32.gmra.mrb[12].mxu1 %v3799_v38  ;;  %v104_v47 = vld [vmem:[#allocation5 + $0x168] sm:$0xff] }
  0x92   :  { %293 = vmatprep.mubr.f32.mxu0 %v74_v51  ;;  %437 = vmatprep.mubr.f32.mxu1 %v3801_v39  ;;  %v103_v51 = vld [vmem:[#allocation5 + $0x160] sm:$0xff] }
  0x95   :  { %294 = vmatmul.mubr.f32.gmra.mrb[14].mxu0 %v73_v52  ;;  %438 = vmatmul.mubr.f32.gmra.mrb[14].mxu1 %v3803_v40  ;;  %v106_v52 = vld [vmem:[#allocation5 + $0x178] sm:$0xff] }
  0x96   :  { %299 = vmatprep.mubr.f32.mxu0 %v76_v56  ;;  %v105_v56 = vld [vmem:[#allocation5 + $0x170] sm:$0xff] }
  0x99   :  { %300 = vmatmul.mubr.f32.gmra.mrb[16].mxu0 %v75_v57  ;;  %v3831_v57 = vld [vmem:[#allocation2] sm:$0xff] }
  0x9a   :  { %305 = vmatprep.mubr.f32.mxu0 %v78_v59  ;;  %v578_v59 = vlaneseq }
  0x9d   :  { %306 = vmatmul.mubr.f32.gmra.mrb[18].mxu0 %v77_v60  ;;  %v3833_v60 = vld [vmem:[#allocation2 + $0x8] sm:$0xff] }
  0x9e   :  { %311 = vmatprep.mubr.f32.mxu0 %v80_v61 }
  0xa1   :  { %312 = vmatmul.mubr.f32.gmra.mrb[20].mxu0 %v79_v62 }
  0xa2   :  { %317 = vmatprep.mubr.f32.mxu0 %v82_v63 }
  0xa5   :  { %318 = vmatmul.mubr.f32.gmra.mrb[22].mxu0 %v81_v0 }
  0xa6   :  { %323 = vmatprep.mubr.f32.mxu0 %v84_v4 }
  0xa9   :  { %324 = vmatmul.mubr.f32.gmra.mrb[24].mxu0 %v83_v7 }
  0xaa   :  { %329 = vmatprep.mubr.f32.mxu0 %v86_v8 }
  0xad   :  { %330 = vmatmul.mubr.f32.gmra.mrb[26].mxu0 %v85_v9  ;;  %v3838_v9 = vld [vmem:[#allocation2 + $0x10] sm:$0xff] }
  0xae   :  { %335 = vmatprep.mubr.f32.mxu0 %v88_v10  ;;  %v3841_v10 = vshrl.u32 %v578_v59, 7 }
  0xb1   :  { %336 = vmatmul.mubr.f32.gmra.mrb[28].mxu0 %v87_v12 }
  0xb2   :  { %341 = vmatprep.mubr.f32.mxu0 %v90_v18  ;;  %v3844_v18 = vld [vmem:[#allocation2 + $0x18] sm:$0xff] }
  0xb5   :  { %342 = vmatmul.mubr.f32.gmra.mrb[30].mxu0 %v89_v19 }
  0xb6   :  { %347 = vmatprep.mubr.f32.mxu0 %v92_v20 }
  0xb9   :  { %348 = vmatmul.mubr.f32.gmra.mrb[32].mxu0 %v91_v23 }
  0xba   :  { %353 = vmatprep.mubr.f32.mxu0 %v94_v27 }
  0xbd   :  { %354 = vmatmul.mubr.f32.gmra.mrb[34].mxu0 %v93_v28 }
  0xbe   :  { %359 = vmatprep.mubr.f32.mxu0 %v96_v31 }
  0xc1   :  { %360 = vmatmul.mubr.f32.gmra.mrb[36].mxu0 %v95_v32 }
  0xc2   :  { %365 = vmatprep.mubr.f32.mxu0 %v98_v33  ;;  %v3850_v33 = vsub.s32 0, %v3841_v10 }
  0xc5   :  { %366 = vmatmul.mubr.f32.gmra.mrb[38].mxu0 %v97_v34 }
  0xc6   :  { %371 = vmatprep.mubr.f32.mxu0 %v100_v35  ;;  %v576_v35 = vld [vmem:[%s4617_s3] sm:$0x3]  ;;  %s3661_s3 = smov [#allocation8]  }
  0xc7   :  { %s3101_s26 = sshll.u32 %s3661_s3, 4  ;;  %s3102_s26 = int_to_ptr.vmem [resolvable:$true] %s3101_s26 }
  0xc8   :  { %s3626_s29 = scalar_lea.vmem %s3102_s26, 512  ;;  %p3631_p11 = scmp.lt.s32.totalorder %s3102_s26, %s3102_s26 }
  0xc9   :  { %372 = vmatmul.mubr.f32.gmra.mrb[40].mxu0 %v99_v36  ;;  %v3857_v36 = vsub.s32 1, %v3841_v10  ;;  %p3627_p10 = scmp.ne.s32.totalorder %s3102_s26, %s3626_s29  ;;  %p3632_p12 = scmp.lt.s32.totalorder %s3626_s29, %s3626_s29 }
  0xca   :  { %377 = vmatprep.mubr.f32.mxu0 %v102_v46 }
  0xcb   :  { %p3633_p13 = por %p3632_p12, %p3631_p11 }
  0xcd   :  { %378 = vmatmul.mubr.f32.gmra.mrb[42].mxu0 %v101_v41  ;;  %p3634_p0 = pnand %p3633_p13, %p3627_p10 }
  0xce   :  { %383 = vmatprep.mubr.f32.mxu0 %v104_v47 }
  0xd1   :  { %384 = vmatmul.mubr.f32.gmra.mrb[44].mxu0 %v103_v51 }
  0xd2   :  { %389 = vmatprep.mubr.f32.mxu0 %v106_v52 }
  0xd5   :  { %390 = vmatmul.mubr.f32.gmra.mrb[46].mxu0 %v105_v56 }
 0x14c   :  { %v253_v61 = vpop.f32.mrb[0].mxu0  ;;  %v397_v62 = vpop.f32.mrb[0].mxu1 }
 0x14d   :  { %v448_v63 = vadd.f32 %v3831_v57, %v253_v61  ;;  %v255_v0 = vpop.f32.mrb[1].mxu0  ;;  %v496_v4 = vadd.f32 %v3831_v57, %v397_v62  ;;  %v399_v7 = vpop.f32.mrb[1].mxu1  ;;  %v3863_v62 = vrot.slane %v576_v35, %v3850_v33 }
 0x14e   :  { %v449_v8 = vadd.f32 %v3833_v60, %v255_v0  ;;  %v497_v12 = vadd.f32 %v3833_v60, %v399_v7  ;;  %v3867_v0 = vrot.slane %v576_v35, %v3857_v36 }
 0x14f   :  { %3300 = vtanh.f32 %v448_v63 }
 0x150   :  { %3302 = vtanh.f32 %v449_v8  ;;  %v259_v19 = vpop.f32.mrb[2].mxu0  ;;  %v403_v20 = vpop.f32.mrb[2].mxu1 }
 0x151   :  { %v450_v23 = vadd.f32 %v3838_v9, %v259_v19  ;;  %v261_v27 = vpop.f32.mrb[3].mxu0  ;;  %3304 = vtanh.f32 %v496_v4  ;;  %v498_v28 = vadd.f32 %v3838_v9, %v403_v20  ;;  %v405_v31 = vpop.f32.mrb[3].mxu1 }
 0x152   :  { %v451_v32 = vadd.f32 %v3844_v18, %v261_v27  ;;  %3306 = vtanh.f32 %v497_v12  ;;  %v499_v34 = vadd.f32 %v3844_v18, %v405_v31 }
 0x153   :  { %3308 = vtanh.f32 %v450_v23 }
 0x154   :  { %3310 = vtanh.f32 %v451_v32  ;;  %v265_v46 = vpop.f32.mrb[4].mxu0  ;;  %v409_v41 = vpop.f32.mrb[4].mxu1 }
 0x155   :  { %v452_v47 = vadd.f32 %v3831_v57, %v265_v46  ;;  %v267_v51 = vpop.f32.mrb[5].mxu0  ;;  %3312 = vtanh.f32 %v498_v28  ;;  %v500_v52 = vadd.f32 %v3831_v57, %v409_v41  ;;  %v411_v56 = vpop.f32.mrb[5].mxu1 }
 0x156   :  { %v453_v61 = vadd.f32 %v3833_v60, %v267_v51  ;;  %3314 = vtanh.f32 %v499_v34  ;;  %v501_v63 = vadd.f32 %v3833_v60, %v411_v56 }
 0x157   :  { %3316 = vtanh.f32 %v452_v47 }
 0x158   :  { %3318 = vtanh.f32 %v453_v61  ;;  %v271_v4 = vpop.f32.mrb[6].mxu0  ;;  %v415_v7 = vpop.f32.mrb[6].mxu1 }
 0x159   :  { %v3301_v8 = vpop.eup %3300  ;;  %v454_v12 = vadd.f32 %v3838_v9, %v271_v4  ;;  %v273_v19 = vpop.f32.mrb[7].mxu0  ;;  %3320 = vtanh.f32 %v500_v52  ;;  %v502_v20 = vadd.f32 %v3838_v9, %v415_v7 }
 0x15a   :  { %v417_v23 = vpop.f32.mrb[7].mxu1  ;;  %v3303_v27 = vpop.eup %3302  ;;  %v455_v28 = vadd.f32 %v3844_v18, %v273_v19  ;;  %v588_v31 = vmul.f32 %v3301_v8, %v3863_v62  ;;  %3322 = vtanh.f32 %v501_v63 }
 0x15b   :  { %v503_v32 = vadd.f32 %v3844_v18, %v417_v23  ;;  %v3305_v34 = vpop.eup %3304  ;;  %3324 = vtanh.f32 %v454_v12  ;;  %v589_v35 = vmul.f32 %v3303_v27, %v3867_v0 }
 0x15c   :  { %v3307_v46 = vpop.eup %3306  ;;  %3326 = vtanh.f32 %v455_v28  ;;  %v277_v41 = vpop.f32.mrb[8].mxu0  ;;  %v636_v28 = vmul.f32 %v3305_v34, %v3863_v62 }
 0x15d   :  { %v421_v47 = vpop.f32.mrb[8].mxu1  ;;  %v3309_v51 = vpop.eup %3308  ;;  %v456_v52 = vadd.f32 %v3831_v57, %v277_v41  ;;  %v652_v61 = vadd.f32 %v589_v35, %v588_v31  ;;  %3328 = vtanh.f32 %v502_v20  ;;  %v637_v20 = vmul.f32 %v3307_v46, %v3867_v0 }
 0x15e   :  { %v279_v56 = vpop.f32.mrb[9].mxu0  ;;  %v504_v4 = vadd.f32 %v3831_v57, %v421_v47  ;;  %v423_v7 = vpop.f32.mrb[9].mxu1  ;;  %v590_v12 = vmul.f32 %v3309_v51, %v3863_v62  ;;  %3330 = vtanh.f32 %v503_v32 }
 0x15f   :  { %v3311_v63 = vpop.eup %3310  ;;  %v457_v8 = vadd.f32 %v3833_v60, %v279_v56  ;;  %v505_v19 = vadd.f32 %v3833_v60, %v423_v7  ;;  %3332 = vtanh.f32 %v456_v52  ;;  %653 = vadd.xlane.f32.xlu0 %v652_v61 }
 0x160   :  { %v3313_v23 = vpop.eup %3312  ;;  %v591_v27 = vmul.f32 %v3311_v63, %v3867_v0  ;;  %v283_v35 = vpop.f32.mrb[10].mxu0 }
 0x161   :  { %v3315_v31 = vpop.eup %3314  ;;  %3334 = vtanh.f32 %v457_v8  ;;  %v427_v41 = vpop.f32.mrb[10].mxu1  ;;  %v638_v47 = vmul.f32 %v3313_v23, %v3863_v62  ;;  %v458_v32 = vadd.f32 %v3838_v9, %v283_v35  ;;  %v3890_v35 = vadd.f32 %v637_v20, %v636_v28 }
 0x162   :  { %v3317_v56 = vpop.eup %3316  ;;  %v285_v51 = vpop.f32.mrb[11].mxu0  ;;  %v655_v7 = vadd.f32 %v591_v27, %v590_v12  ;;  %3336 = vtanh.f32 %v504_v4  ;;  %v506_v52 = vadd.f32 %v3838_v9, %v427_v41  ;;  %v639_v4 = vmul.f32 %v3315_v31, %v3867_v0 }
 0x163   :  { %v429_v61 = vpop.f32.mrb[11].mxu1  ;;  %v3319_v63 = vpop.eup %3318  ;;  %v459_v34 = vadd.f32 %v3844_v18, %v285_v51  ;;  %v592_v46 = vmul.f32 %v3317_v56, %v3863_v62  ;;  %3338 = vtanh.f32 %v505_v19 }
 0x164   :  { %v507_v8 = vadd.f32 %v3844_v18, %v429_v61  ;;  %v3321_v43 = vpop.eup %3320  ;;  %3340 = vtanh.f32 %v458_v32  ;;  %656 = vadd.xlane.f32.xlu0 %v655_v7  ;;  %v593_v23 = vmul.f32 %v3319_v63, %v3867_v0  ;;  %v289_v27 = vpop.f32.mrb[12].mxu0  ;;  %v3898_v31 = vadd.f32 %v639_v4, %v638_v47 }
 0x165   :  { %v3323_v12 = vpop.eup %3322  ;;  %3342 = vtanh.f32 %v459_v34  ;;  %v640_v41 = vmul.f32 %v3321_v43, %v3863_v62  ;;  %v433_v51 = vpop.f32.mrb[12].mxu1  ;;  %v460_v19 = vadd.f32 %v3831_v57, %v289_v27 }
 0x166   :  { %v3325_v42 = vpop.eup %3324  ;;  %v291_v56 = vpop.f32.mrb[13].mxu0  ;;  %v658_v61 = vadd.f32 %v593_v23, %v592_v46  ;;  %3344 = vtanh.f32 %v506_v52  ;;  %v641_v32 = vmul.f32 %v3323_v12, %v3867_v0  ;;  %v508_v52 = vadd.f32 %v3831_v57, %v433_v51 }
 0x167   :  { %v435_v7 = vpop.f32.mrb[13].mxu1  ;;  %v3327_v63 = vpop.eup %3326  ;;  %v461_v28 = vadd.f32 %v3833_v60, %v291_v56  ;;  %v594_v20 = vmul.f32 %v3325_v42, %v3863_v62  ;;  %3346 = vtanh.f32 %v507_v8 }
 0x168   :  { %v3329_v34 = vpop.eup %3328  ;;  %3348 = vtanh.f32 %v460_v19  ;;  %659 = vadd.xlane.f32.xlu1 %v658_v61  ;;  %v595_v43 = vmul.f32 %v3327_v63, %v3867_v0  ;;  %v3901_v27 = vadd.f32 %v641_v32, %v640_v41  ;;  %v295_v23 = vpop.f32.mrb[14].mxu0  ;;  %v509_v56 = vadd.f32 %v3833_v60, %v435_v7 }
 0x169   :  { %v3331_v46 = vpop.eup %3330  ;;  %3350 = vtanh.f32 %v461_v28  ;;  %v642_v12 = vmul.f32 %v3329_v34, %v3863_v62  ;;  %v439_v42 = vpop.f32.mrb[14].mxu1  ;;  %v462_v47 = vadd.f32 %v3838_v9, %v295_v23 }
 0x16a   :  { %v3333_v8 = vpop.eup %3332  ;;  %v297_v4 = vpop.f32.mrb[15].mxu0  ;;  %v661_v19 = vadd.f32 %v595_v43, %v594_v20  ;;  %v643_v61 = vmul.f32 %v3331_v46, %v3867_v0  ;;  %3352 = vtanh.f32 %v508_v52  ;;  %v510_v28 = vadd.f32 %v3838_v9, %v439_v42 }
 0x16b   :  { %v441_v41 = vpop.f32.mrb[15].mxu1  ;;  %v3335_v32 = vpop.eup %3334  ;;  %v463_v51 = vadd.f32 %v3844_v18, %v297_v4  ;;  %v596_v63 = vmul.f32 %v3333_v8, %v3863_v62  ;;  %3354 = vtanh.f32 %v509_v56 }
 0x16c   :  { %v3337_v34 = vpop.eup %3336  ;;  %3356 = vtanh.f32 %v462_v47  ;;  %662 = vadd.xlane.f32.xlu1 %v661_v19  ;;  %v597_v7 = vmul.f32 %v3335_v32, %v3867_v0  ;;  %v3912_v23 = vadd.f32 %v643_v61, %v642_v12  ;;  %v511_v20 = vadd.f32 %v3844_v18, %v441_v41  ;;  %v301_v52 = vpop.f32.mrb[16].mxu0 }
 0x16d   :  { %v3339_v43 = vpop.eup %3338  ;;  %3358 = vtanh.f32 %v463_v51  ;;  %v644_v46 = vmul.f32 %v3337_v34, %v3863_v62  ;;  %v464_v8 = vadd.f32 %v3831_v57, %v301_v52  ;;  %v303_v56 = vpop.f32.mrb[17].mxu0 }
 0x16e   :  { %v3341_v4 = vpop.eup %3340  ;;  %v664_v30 = vadd.f32 %v597_v7, %v596_v63  ;;  %v645_v42 = vmul.f32 %v3339_v43, %v3867_v0  ;;  %3360 = vtanh.f32 %v510_v28  ;;  %v465_v19 = vadd.f32 %v3833_v60, %v303_v56 }
 0x16f   :  { %v3343_v47 = vpop.eup %3342  ;;  %v598_v12 = vmul.f32 %v3341_v4, %v3863_v62  ;;  %3362 = vtanh.f32 %v511_v20 }
 0x170   :  { %v3345_v61 = vpop.eup %3344  ;;  %3364 = vtanh.f32 %v464_v8  ;;  %665 = vadd.xlane.f32.xlu0 %v664_v30  ;;  %v599_v41 = vmul.f32 %v3343_v47, %v3867_v0  ;;  %v3921_v32 = vadd.f32 %v645_v42, %v644_v46  ;;  %v307_v34 = vpop.f32.mrb[18].mxu0 }
 0x171   :  { %v3347_v51 = vpop.eup %3346  ;;  %3366 = vtanh.f32 %v465_v19  ;;  %v646_v63 = vmul.f32 %v3345_v61, %v3863_v62  ;;  %v466_v28 = vadd.f32 %v3838_v9, %v307_v34  ;;  %v309_v43 = vpop.f32.mrb[19].mxu0 }
 0x172   :  { %v3349_v7 = vpop.eup %3348  ;;  %v667_v52 = vadd.f32 %v599_v41, %v598_v12  ;;  %v647_v4 = vmul.f32 %v3347_v51, %v3867_v0  ;;  %v467_v8 = vadd.f32 %v3844_v18, %v309_v43 }
 0x173   :  { %v3351_v20 = vpop.eup %3350  ;;  %v600_v30 = vmul.f32 %v3349_v7, %v3863_v62  ;;  %3368 = vtanh.f32 %v466_v28 }
 0x174   :  { %v3353_v56 = vpop.eup %3352  ;;  %668 = vadd.xlane.f32.xlu1 %v667_v52  ;;  %v601_v46 = vmul.f32 %v3351_v20, %v3867_v0  ;;  %v3929_v42 = vadd.f32 %v647_v4, %v646_v63  ;;  %3370 = vtanh.f32 %v467_v8  ;;  %v313_v19 = vpop.f32.mrb[20].mxu0 }
 0x175   :  { %v3355_v47 = vpop.eup %3354  ;;  %v648_v61 = vmul.f32 %v3353_v56, %v3863_v62  ;;  %v468_v41 = vadd.f32 %v3831_v57, %v313_v19  ;;  %v315_v51 = vpop.f32.mrb[21].mxu0 }
 0x176   :  { %v3357_v12 = vpop.eup %3356  ;;  %v670_v34 = vadd.f32 %v601_v46, %v600_v30  ;;  %v649_v43 = vmul.f32 %v3355_v47, %v3867_v0  ;;  %v469_v28 = vadd.f32 %v3833_v60, %v315_v51 }
 0x177   :  { %v3359_v7 = vpop.eup %3358  ;;  %v602_v52 = vmul.f32 %v3357_v12, %v3863_v62  ;;  %3372 = vtanh.f32 %v468_v41 }
 0x178   :  { %v3361_v20 = vpop.eup %3360  ;;  %671 = vadd.xlane.f32.xlu0 %v670_v34  ;;  %v603_v63 = vmul.f32 %v3359_v7, %v3867_v0  ;;  %v3937_v4 = vadd.f32 %v649_v43, %v648_v61  ;;  %3374 = vtanh.f32 %v469_v28  ;;  %v319_v56 = vpop.f32.mrb[22].mxu0 }
 0x179   :  { %v3363_v8 = vpop.eup %3362  ;;  %v650_v19 = vmul.f32 %v3361_v20, %v3863_v62  ;;  %v470_v46 = vadd.f32 %v3838_v9, %v319_v56  ;;  %v321_v47 = vpop.f32.mrb[23].mxu0 }
 0x17a   :  { %v3365_v30 = vpop.eup %3364  ;;  %v673_v29 = vadd.f32 %v603_v63, %v602_v52  ;;  %v651_v51 = vmul.f32 %v3363_v8, %v3867_v0  ;;  %v471_v41 = vadd.f32 %v3844_v18, %v321_v47 }
 0x17b   :  { %v3367_v12 = vpop.eup %3366  ;;  %v604_v34 = vmul.f32 %v3365_v30, %v3863_v62  ;;  %3376 = vtanh.f32 %v470_v46 }
 0x17c   :  { %674 = vadd.xlane.f32.xlu1 %v673_v29  ;;  %v605_v61 = vmul.f32 %v3367_v12, %v3867_v0  ;;  %v3945_v43 = vadd.f32 %v651_v51, %v650_v19  ;;  %3378 = vtanh.f32 %v471_v41  ;;  %v325_v7 = vpop.f32.mrb[24].mxu0 }
 0x17d   :  { %v3369_v28 = vpop.eup %3368  ;;  %v472_v20 = vadd.f32 %v3831_v57, %v325_v7  ;;  %v327_v56 = vpop.f32.mrb[25].mxu0 }
 0x17e   :  { %v676_v52 = vadd.f32 %v605_v61, %v604_v34  ;;  %v3371_v63 = vpop.eup %3370  ;;  %v473_v8 = vadd.f32 %v3833_v60, %v327_v56  ;;  %v606_v47 = vmul.f32 %v3369_v28, %v3863_v62 }
 0x17f   :  { %3380 = vtanh.f32 %v472_v20  ;;  %v607_v29 = vmul.f32 %v3371_v63, %v3867_v0 }
 0x180   :  { %677 = vadd.xlane.f32.xlu0 %v676_v52  ;;  %3382 = vtanh.f32 %v473_v8  ;;  %v331_v30 = vpop.f32.mrb[26].mxu0 }
 0x181   :  { %v3373_v19 = vpop.eup %3372  ;;  %v474_v46 = vadd.f32 %v3838_v9, %v331_v30  ;;  %v333_v51 = vpop.f32.mrb[27].mxu0  ;;  %v679_v12 = vadd.f32 %v607_v29, %v606_v47 }
 0x182   :  { %v3375_v41 = vpop.eup %3374  ;;  %v475_v7 = vadd.f32 %v3844_v18, %v333_v51  ;;  %v608_v34 = vmul.f32 %v3373_v19, %v3863_v62 }
 0x183   :  { %3384 = vtanh.f32 %v474_v46  ;;  %680 = vadd.xlane.f32.xlu1 %v679_v12  ;;  %v609_v61 = vmul.f32 %v3375_v41, %v3867_v0 }
 0x184   :  { %3386 = vtanh.f32 %v475_v7  ;;  %v337_v28 = vpop.f32.mrb[28].mxu0 }
 0x185   :  { %v3377_v20 = vpop.eup %3376  ;;  %v476_v56 = vadd.f32 %v3831_v57, %v337_v28  ;;  %v339_v52 = vpop.f32.mrb[29].mxu0  ;;  %v682_v63 = vadd.f32 %v609_v61, %v608_v34 }
 0x186   :  { %v3379_v8 = vpop.eup %3378  ;;  %v477_v30 = vadd.f32 %v3833_v60, %v339_v52  ;;  %v610_v47 = vmul.f32 %v3377_v20, %v3863_v62 }
 0x187   :  { %3388 = vtanh.f32 %v476_v56  ;;  %683 = vadd.xlane.f32.xlu0 %v682_v63  ;;  %v611_v29 = vmul.f32 %v3379_v8, %v3867_v0 }
 0x188   :  { %3390 = vtanh.f32 %v477_v30  ;;  %v343_v19 = vpop.f32.mrb[30].mxu0 }
 0x189   :  { %v3381_v46 = vpop.eup %3380  ;;  %v478_v51 = vadd.f32 %v3838_v9, %v343_v19  ;;  %v345_v12 = vpop.f32.mrb[31].mxu0  ;;  %v685_v41 = vadd.f32 %v611_v29, %v610_v47 }
 0x18a   :  { %v3383_v7 = vpop.eup %3382  ;;  %v479_v28 = vadd.f32 %v3844_v18, %v345_v12  ;;  %v612_v34 = vmul.f32 %v3381_v46, %v3863_v62 }
 0x18b   :  { %3392 = vtanh.f32 %v478_v51  ;;  %686 = vadd.xlane.f32.xlu1 %v685_v41  ;;  %v613_v61 = vmul.f32 %v3383_v7, %v3867_v0 }
 0x18c   :  { %3394 = vtanh.f32 %v479_v28  ;;  %v349_v20 = vpop.f32.mrb[32].mxu0 }
 0x18d   :  { %v3385_v56 = vpop.eup %3384  ;;  %v688_v52 = vadd.f32 %v613_v61, %v612_v34  ;;  %v480_v63 = vadd.f32 %v3831_v57, %v349_v20  ;;  %v351_v8 = vpop.f32.mrb[33].mxu0 }
 0x18e   :  { %v3387_v30 = vpop.eup %3386  ;;  %v614_v19 = vmul.f32 %v3385_v56, %v3863_v62  ;;  %v481_v47 = vadd.f32 %v3833_v60, %v351_v8 }
 0x18f   :  { %689 = vadd.xlane.f32.xlu0 %v688_v52  ;;  %v615_v29 = vmul.f32 %v3387_v30, %v3867_v0  ;;  %3396 = vtanh.f32 %v480_v63 }
 0x190   :  { %3398 = vtanh.f32 %v481_v47  ;;  %v355_v46 = vpop.f32.mrb[34].mxu0 }
 0x191   :  { %v3389_v51 = vpop.eup %3388  ;;  %v691_v12 = vadd.f32 %v615_v29, %v614_v19  ;;  %v482_v41 = vadd.f32 %v3838_v9, %v355_v46  ;;  %v357_v7 = vpop.f32.mrb[35].mxu0 }
 0x192   :  { %v3391_v28 = vpop.eup %3390  ;;  %v616_v34 = vmul.f32 %v3389_v51, %v3863_v62  ;;  %v483_v61 = vadd.f32 %v3844_v18, %v357_v7 }
 0x193   :  { %692 = vadd.xlane.f32.xlu1 %v691_v12  ;;  %v617_v20 = vmul.f32 %v3391_v28, %v3867_v0  ;;  %3400 = vtanh.f32 %v482_v41 }
 0x194   :  { %3402 = vtanh.f32 %v483_v61  ;;  %v361_v56 = vpop.f32.mrb[36].mxu0 }
 0x195   :  { %v3393_v52 = vpop.eup %3392  ;;  %v694_v63 = vadd.f32 %v617_v20, %v616_v34  ;;  %v484_v8 = vadd.f32 %v3831_v57, %v361_v56  ;;  %v363_v30 = vpop.f32.mrb[37].mxu0 }
 0x196   :  { %v3395_v19 = vpop.eup %3394  ;;  %v618_v47 = vmul.f32 %v3393_v52, %v3863_v62  ;;  %v485_v29 = vadd.f32 %v3833_v60, %v363_v30 }
 0x197   :  { %695 = vadd.xlane.f32.xlu0 %v694_v63  ;;  %3404 = vtanh.f32 %v484_v8  ;;  %v619_v46 = vmul.f32 %v3395_v19, %v3867_v0 }
 0x198   :  { %3406 = vtanh.f32 %v485_v29  ;;  %v367_v51 = vpop.f32.mrb[38].mxu0 }
 0x199   :  { %v3397_v12 = vpop.eup %3396  ;;  %v697_v41 = vadd.f32 %v619_v46, %v618_v47  ;;  %v486_v7 = vadd.f32 %v3838_v9, %v367_v51  ;;  %v369_v28 = vpop.f32.mrb[39].mxu0 }
 0x19a   :  { %v3399_v34 = vpop.eup %3398  ;;  %v487_v61 = vadd.f32 %v3844_v18, %v369_v28  ;;  %v620_v20 = vmul.f32 %v3397_v12, %v3863_v62 }
 0x19b   :  { %725 = vadd.xlane.f32.xlu0 %v3890_v35  ;;  %698 = vadd.xlane.f32.xlu1 %v697_v41  ;;  %3408 = vtanh.f32 %v486_v7  ;;  %v621_v56 = vmul.f32 %v3399_v34, %v3867_v0 }
 0x19c   :  { %3410 = vtanh.f32 %v487_v61  ;;  %v373_v52 = vpop.f32.mrb[40].mxu0 }
 0x19d   :  { %v3401_v63 = vpop.eup %3400  ;;  %v488_v8 = vadd.f32 %v3831_v57, %v373_v52  ;;  %v375_v30 = vpop.f32.mrb[41].mxu0  ;;  %v700_v19 = vadd.f32 %v621_v56, %v620_v20 }
 0x19e   :  { %v3403_v47 = vpop.eup %3402  ;;  %v489_v29 = vadd.f32 %v3833_v60, %v375_v30  ;;  %v622_v46 = vmul.f32 %v3401_v63, %v3863_v62 }
 0x19f   :  { %3412 = vtanh.f32 %v488_v8  ;;  %731 = vadd.xlane.f32.xlu0 %v3901_v27  ;;  %728 = vadd.xlane.f32.xlu1 %v3898_v31  ;;  %v623_v35 = vmul.f32 %v3403_v47, %v3867_v0 }
 0x1a0   :  { %3414 = vtanh.f32 %v489_v29  ;;  %v379_v51 = vpop.f32.mrb[42].mxu0 }
 0x1a1   :  { %v3405_v12 = vpop.eup %3404  ;;  %v490_v41 = vadd.f32 %v3838_v9, %v379_v51  ;;  %v381_v7 = vpop.f32.mrb[43].mxu0  ;;  %v703_v28 = vadd.f32 %v623_v35, %v622_v46 }
 0x1a2   :  { %v3407_v34 = vpop.eup %3406  ;;  %v491_v61 = vadd.f32 %v3844_v18, %v381_v7  ;;  %v624_v20 = vmul.f32 %v3405_v12, %v3863_v62 }
 0x1a3   :  { %3416 = vtanh.f32 %v490_v41  ;;  %737 = vadd.xlane.f32.xlu0 %v3921_v32  ;;  %734 = vadd.xlane.f32.xlu1 %v3912_v23  ;;  %v625_v31 = vmul.f32 %v3407_v34, %v3867_v0 }
 0x1a4   :  { %3418 = vtanh.f32 %v491_v61  ;;  %v385_v27 = vpop.f32.mrb[44].mxu0 }
 0x1a5   :  { %v3409_v56 = vpop.eup %3408  ;;  %v492_v52 = vadd.f32 %v3831_v57, %v385_v27  ;;  %v387_v63 = vpop.f32.mrb[45].mxu0  ;;  %v706_v8 = vadd.f32 %v625_v31, %v624_v20 }
 0x1a6   :  { %v3411_v30 = vpop.eup %3410  ;;  %v493_v47 = vadd.f32 %v3833_v60, %v387_v63  ;;  %v626_v29 = vmul.f32 %v3409_v56, %v3863_v62 }
 0x1a7   :  { %3420 = vtanh.f32 %v492_v52  ;;  %740 = vadd.xlane.f32.xlu1 %v3929_v42  ;;  %701 = vadd.xlane.f32.xlu0 %v700_v19  ;;  %v627_v23 = vmul.f32 %v3411_v30, %v3867_v0 }
 0x1a8   :  { %3422 = vtanh.f32 %v493_v47  ;;  %v391_v32 = vpop.f32.mrb[46].mxu0 }
 0x1a9   :  { %v3413_v46 = vpop.eup %3412  ;;  %v494_v35 = vadd.f32 %v3838_v9, %v391_v32  ;;  %v393_v51 = vpop.f32.mrb[47].mxu0  ;;  %v709_v57 = vadd.f32 %v627_v23, %v626_v29 }
 0x1aa   :  { %v3415_v12 = vpop.eup %3414  ;;  %v495_v41 = vadd.f32 %v3844_v18, %v393_v51  ;;  %v628_v60 = vmul.f32 %v3413_v46, %v3863_v62 }
 0x1ab   :  { %3424 = vtanh.f32 %v494_v35  ;;  %704 = vadd.xlane.f32.xlu1 %v703_v28  ;;  %707 = vadd.xlane.f32.xlu0 %v706_v8  ;;  %v629_v42 = vmul.f32 %v3415_v12, %v3867_v0 }
 0x1ac   :  { %3426 = vtanh.f32 %v495_v41 }
 0x1ad   :  { %v3417_v19 = vpop.eup %3416  ;;  %v712_v7 = vadd.f32 %v629_v42, %v628_v60 }
 0x1ae   :  { %v3419_v34 = vpop.eup %3418  ;;  %v630_v61 = vmul.f32 %v3417_v19, %v3863_v62 }
 0x1af   :  { %710 = vadd.xlane.f32.xlu1 %v709_v57  ;;  %713 = vadd.xlane.f32.xlu0 %v712_v7  ;;  %v631_v9 = vmul.f32 %v3419_v34, %v3867_v0 }
 0x1b1   :  { %v3421_v20 = vpop.eup %3420  ;;  %v715_v31 = vadd.f32 %v631_v9, %v630_v61 }
 0x1b2   :  { %v3423_v18 = vpop.eup %3422  ;;  %v632_v27 = vmul.f32 %v3421_v20, %v3863_v62 }
 0x1b3   :  { %716 = vadd.xlane.f32.xlu1 %v715_v31  ;;  %v633_v28 = vmul.f32 %v3423_v18, %v3867_v0 }
 0x1b5   :  { %v3425_v56 = vpop.eup %3424  ;;  %v718_v52 = vadd.f32 %v633_v28, %v632_v27 }
 0x1b6   :  { %v3427_v63 = vpop.eup %3426  ;;  %v634_v8 = vmul.f32 %v3425_v56, %v3863_v62 }
 0x1b7   :  { %719 = vadd.xlane.f32.xlu0 %v718_v52  ;;  %v635_v30 = vmul.f32 %v3427_v63, %v3867_v0 }
 0x1b9   :  { %v721_v47 = vadd.f32 %v635_v30, %v634_v8 }
 0x1bb   :  { %722 = vadd.xlane.f32.xlu1 %v721_v47  ;;  %743 = vadd.xlane.f32.xlu0 %v3937_v4  ;;  %v781_v4 = vand.u32 127, %v578_v59 }
 0x1bd   :  { %v4038_v19 = vsub.s32 %v781_v4, %v3841_v10 }
 0x1bf   :  { %746 = vadd.xlane.f32.xlu1 %v3945_v43  ;;  %v786_v43 = vadd.s32 4294967288, %v781_v4 }
 0x1c1   :  { %v4033_v60 = vsub.s32 %v786_v43, %v3841_v10 }
 0x1ec   :  { %v4009_v29 = vpop.xlane.xlu0 %653 }
 0x1ed   :  { %v785_v28 = vrot.slane %v4009_v29, %v4038_v19 }
 0x1f1   :  { %v4013_v32 = vpop.xlane.xlu0 %656 }
 0x1f2   :  { %v790_v61 = vrot.slane %v4013_v32, %v4033_v60 }
 0x1f4   :  { %v792_v43 = vsel %vm791_vm0, %v790_v61, %v785_v28 }
 0x1f5   :  { %v4011_v23 = vpop.xlane.xlu1 %659 }
 0x1f6   :  { %v796_v9 = vrot.slane %v4011_v23, %v4038_v19 }
 0x1f9   :  { %v4015_v46 = vpop.xlane.xlu1 %662 }
 0x1fa   :  { %v800_v7 = vrot.slane %v4015_v46, %v4033_v60 }
 0x1fc   :  { %v801_v56 = vsel %vm791_vm0, %v800_v7, %v796_v9 }
 0x1fd   :  { %v4017_v35 = vpop.xlane.xlu0 %665  ;;  %v929_v21 = vsel %vm928_vm1, %v801_v56, %v792_v43 }
 0x1fe   :  { %v805_v18 = vrot.slane %v4017_v35, %v4038_v19 }
 0x201   :  { %v4019_v62 = vpop.xlane.xlu1 %668 }
 0x202   :  { %v809_v59 = vrot.slane %v4019_v62, %v4033_v60 }
 0x204   :  { %v810_v8 = vsel %vm791_vm0, %v809_v59, %v805_v18 }
 0x205   :  { %v4021_v51 = vpop.xlane.xlu0 %671  ;;  %v931_v16 = vsel %vm930_vm2, %v810_v8, %v929_v21 }
 0x206   :  { %v814_v52 = vrot.slane %v4021_v51, %v4038_v19 }
 0x209   :  { %v4023_v0 = vpop.xlane.xlu1 %674 }
 0x20a   :  { %v818_v20 = vrot.slane %v4023_v0, %v4033_v60 }
 0x20c   :  { %v819_v7 = vsel %vm791_vm0, %v818_v20, %v814_v52 }
 0x20d   :  { %v4026_v57 = vpop.xlane.xlu0 %677  ;;  %v933_v61 = vsel %vm932_vm3, %v819_v7, %v931_v16 }
 0x20e   :  { %v823_v30 = vrot.slane %v4026_v57, %v4038_v19 }
 0x210   :  { %v4028_v12 = vpop.xlane.xlu1 %680 }
 0x211   :  { %v827_v27 = vrot.slane %v4028_v12, %v4033_v60 }
 0x213   :  { %v828_v59 = vsel %vm791_vm0, %v827_v27, %v823_v30 }
 0x214   :  { %v4030_v41 = vpop.xlane.xlu0 %683  ;;  %v935_v21 = vsel %vm934_vm4, %v828_v59, %v933_v61 }
 0x215   :  { %v832_v9 = vrot.slane %v4030_v41, %v4038_v19 }
 0x218   :  { %v4035_v42 = vpop.xlane.xlu1 %686 }
 0x219   :  { %v836_v63 = vrot.slane %v4035_v42, %v4033_v60 }
 0x21b   :  { %v837_v11 = vsel %vm791_vm0, %v836_v63, %v832_v9 }
 0x21c   :  { %v4044_v34 = vpop.xlane.xlu0 %689  ;;  %v937_v63 = vsel %vm936_vm5, %v837_v11, %v935_v21 }
 0x21d   :  { %v841_v18 = vrot.slane %v4044_v34, %v4038_v19 }
 0x220   :  { %v4052_v31 = vpop.xlane.xlu1 %692 }
 0x221   :  { %v845_v47 = vrot.slane %v4052_v31, %v4033_v60 }
 0x223   :  { %v846_v52 = vsel %vm791_vm0, %v845_v47, %v841_v18 }
 0x224   :  { %v4070_v4 = vpop.xlane.xlu0 %695  ;;  %v939_v8 = vsel %vm938_vm6, %v846_v52, %v937_v63 }
 0x225   :  { %v850_v27 = vrot.slane %v4070_v4, %v4038_v19 }
 0x228   :  { %v4083_v28 = vpop.xlane.xlu0 %725  ;;  %v4085_v20 = vpop.xlane.xlu1 %698 }
 0x229   :  { %v854_v56 = vrot.slane %v4085_v20, %v4033_v60  ;;  %v895_v38 = vrot.slane %v4083_v28, %v4038_v19 }
 0x22b   :  { %v855_v16 = vsel %vm791_vm0, %v854_v56, %v850_v27 }
 0x22c   :  { %v4096_v30 = vpop.xlane.xlu0 %731  ;;  %v4098_v47 = vpop.xlane.xlu1 %728  ;;  %v941_v43 = vsel %vm940_vm7, %v855_v16, %v939_v8 }
 0x22d   :  { %v952_v7 = vsel %vm951_vm8, %v941_v43, -inf  ;;  %v899_v40 = vrot.slane %v4098_v47, %v4033_v60  ;;  %v904_v26 = vrot.slane %v4096_v30, %v4038_v19 }
 0x22e   :  { %953 = vmax.xlane.f32.xlu0 %v952_v7 }
 0x230   :  { %v4102_v9 = vpop.xlane.xlu0 %737  ;;  %v4104_v59 = vpop.xlane.xlu1 %734 }
 0x231   :  { %v913_v25 = vrot.slane %v4102_v9, %v4038_v19 }
 0x234   :  { %v4106_v18 = vpop.xlane.xlu1 %740  ;;  %v4108_v11 = vpop.xlane.xlu0 %701 }
 0x235   :  { %v859_v58 = vrot.slane %v4108_v11, %v4038_v19 }
 0x238   :  { %v4110_v61 = vpop.xlane.xlu1 %704  ;;  %v4112_v52 = vpop.xlane.xlu0 %707 }
 0x239   :  { %v868_v63 = vrot.slane %v4112_v52, %v4038_v19  ;;  %v863_v3 = vrot.slane %v4110_v61, %v4033_v60 }
 0x23c   :  { %v4114_v27 = vpop.xlane.xlu1 %710  ;;  %v4116_v56 = vpop.xlane.xlu0 %713 }
 0x23d   :  { %v872_v16 = vrot.slane %v4114_v27, %v4033_v60  ;;  %v877_v8 = vrot.slane %v4116_v56, %v4038_v19 }
 0x23f   :  { %v873_v54 = vsel %vm791_vm0, %v872_v16, %v868_v63  ;;  %v908_v63 = vrot.slane %v4104_v59, %v4033_v60  ;;  %v864_v16 = vsel %vm791_vm0, %v863_v3, %v859_v58  ;;  %v900_v58 = vsel %vm791_vm0, %v899_v40, %v895_v38 }
 0x240   :  { %v4118_v21 = vpop.xlane.xlu1 %716 }
 0x241   :  { %v881_v43 = vrot.slane %v4118_v21, %v4033_v60  ;;  %v909_v5 = vsel %vm791_vm0, %v908_v63, %v904_v26  ;;  %v4178_v63 = vsub.s32 4, %v3841_v10 }
 0x243   :  { %v882_v37 = vsel %vm791_vm0, %v881_v43, %v877_v8  ;;  %v917_v8 = vrot.slane %v4106_v18, %v4033_v60  ;;  %v942_v43 = vsel %vm928_vm1, %v873_v54, %v864_v16 }
 0x244   :  { %v4128_v7 = vpop.xlane.xlu0 %719  ;;  %v943_v15 = vsel %vm930_vm2, %v882_v37, %v942_v43 }
 0x245   :  { %v886_v48 = vrot.slane %v4128_v7, %v4038_v19  ;;  %v918_v37 = vsel %vm791_vm0, %v917_v8, %v913_v25  ;;  %v4184_v25 = vsub.s32 2, %v3841_v10  ;;  %v4187_v8 = vsub.s32 5, %v3841_v10 }
 0x248   :  { %v4142_v39 = vpop.xlane.xlu1 %722  ;;  %v4144_v24 = vpop.xlane.xlu0 %743 }
 0x249   :  { %v890_v22 = vrot.slane %v4142_v39, %v4033_v60  ;;  %v922_v13 = vrot.slane %v4144_v24, %v4038_v19 }
 0x24b   :  { %v891_v17 = vsel %vm791_vm0, %v890_v22, %v886_v48 }
 0x24c   :  { %v944_v3 = vsel %vm932_vm3, %v891_v17, %v943_v15  ;;  %v4164_v14 = vpop.xlane.xlu1 %746  ;;  %v3659_v17 = vmov 0  }
 0x24d   :  { %v926_v6 = vrot.slane %v4164_v14, %v4033_v60  ;;  %v945_v54 = vsel %vm934_vm4, %v900_v58, %v944_v3  ;;  %3299 = vset.pattern.permute.xlu1 %v3659_v17  ;;  %3298 = vset.pattern.permute.xlu0 %v3659_v17 }
 0x24e   :  { %v946_v48 = vsel %vm936_vm5, %v909_v5, %v945_v54 }
 0x24f   :  { %v927_v22 = vsel %vm791_vm0, %v926_v6, %v922_v13  ;;  %v947_v16 = vsel %vm938_vm6, %v918_v37, %v946_v48  ;;  %v4192_v37 = vsub.s32 6, %v3841_v10 }
 0x250   :  { %v948_v38 = vsel %vm940_vm7, %v927_v22, %v947_v16 }
 0x251   :  { %v955_v15 = vsel %vm951_vm8, %v948_v38, -inf  ;;  %v4199_v38 = vsub.s32 7, %v3841_v10 }
 0x252   :  { %956 = vmax.xlane.f32.xlu1 %v955_v15 }
 0x2bb   :  { %v954_v26 = vpop.xlane.xlu0 %953 }
 0x2bc   :  { %v963_v40 = vrot.slane %v954_v26, %v3850_v33  ;;  %v967_v5 = vrot.slane %v954_v26, %v3857_v36  ;;  %v979_v43 = vrot.slane %v954_v26, %v4178_v63  ;;  %v971_v48 = vrot.slane %v954_v26, %v4184_v25 }
 0x2bd   :  { %v4203_v17 = vrot.slane %v954_v26, %v4192_v37 }
 0x2be   :  { %v1040_v6 = vsub.f32 %v4009_v29, %v963_v40  ;;  %v1041_v13 = vsub.f32 %v4013_v32, %v963_v40  ;;  %v1042_v58 = vsub.f32 %v4011_v23, %v967_v5  ;;  %v1043_v29 = vsub.f32 %v4015_v46, %v967_v5 }
 0x2bf   :  { %v983_v32 = vrot.slane %v954_v26, %v4187_v8  ;;  %v1049_v22 = vsub.f32 %v4028_v12, %v979_v43  ;;  %v1044_v23 = vsub.f32 %v4017_v35, %v971_v48  ;;  %v4207_v5 = vsub.s32 3, %v3841_v10 }
 0x2c0   :  { %v1072_v3 = vmul.f32 1.442695, %v1040_v6  ;;  %v1074_v54 = vmul.f32 1.442695, %v1041_v13  ;;  %v1076_v16 = vmul.f32 1.442695, %v1042_v58  ;;  %v1045_v12 = vsub.f32 %v4019_v62, %v971_v48 }
 0x2c1   :  { %v1078_v15 = vmul.f32 1.442695, %v1043_v29  ;;  %v1051_v40 = vsub.f32 %v4035_v42, %v983_v32  ;;  %v1090_v46 = vmul.f32 1.442695, %v1049_v22  ;;  %v1080_v6 = vmul.f32 1.442695, %v1044_v23 }
 0x2c2   :  { %3428 = vpow2.f32 %v1072_v3  ;;  %v4211_v13 = vrot.slane %v954_v26, %v4199_v38  ;;  %v1053_v35 = vsub.f32 %v4052_v31, %v4203_v17  ;;  %v975_v42 = vrot.slane %v954_v26, %v4207_v5 }
 0x2c3   :  { %3430 = vpow2.f32 %v1074_v54  ;;  %v1094_v58 = vmul.f32 1.442695, %v1051_v40  ;;  %v1082_v10 = vmul.f32 1.442695, %v1045_v12  ;;  %v1050_v12 = vsub.f32 %v4030_v41, %v983_v32 }
 0x2c4   :  { %3432 = vpow2.f32 %v1076_v16  ;;  %v1055_v62 = vsub.f32 %v4085_v20, %v4211_v13  ;;  %v1098_v48 = vmul.f32 1.442695, %v1053_v35  ;;  %v1046_v31 = vsub.f32 %v4021_v51, %v975_v42 }
 0x2c5   :  { %3434 = vpow2.f32 %v1078_v15  ;;  %v1047_v16 = vsub.f32 %v4023_v0, %v975_v42  ;;  %v1048_v20 = vsub.f32 %v4026_v57, %v979_v43  ;;  %v1052_v42 = vsub.f32 %v4044_v34, %v4203_v17 }
 0x2c6   :  { %3436 = vpow2.f32 %v1090_v46  ;;  %v1102_v26 = vmul.f32 1.442695, %v1055_v62  ;;  %v1084_v23 = vmul.f32 1.442695, %v1046_v31 }
 0x2c7   :  { %3438 = vpow2.f32 %v1080_v6  ;;  %v1086_v40 = vmul.f32 1.442695, %v1047_v16  ;;  %v1088_v6 = vmul.f32 1.442695, %v1048_v20  ;;  %v1096_v34 = vmul.f32 1.442695, %v1052_v42 }
 0x2c8   :  { %3440 = vpow2.f32 %v1094_v58 }
 0x2c9   :  { %3442 = vpow2.f32 %v1082_v10  ;;  %v1092_v10 = vmul.f32 1.442695, %v1050_v12 }
 0x2ca   :  { %3444 = vpow2.f32 %v1098_v48 }
 0x2cb   :  { %3446 = vpow2.f32 %v1102_v26  ;;  %v1054_v26 = vsub.f32 %v4070_v4, %v4211_v13 }
 0x2cc   :  { %v4215_v3 = vpop.eup %3428  ;;  %3448 = vpow2.f32 %v1084_v23 }
 0x2cd   :  { %v4218_v54 = vpop.eup %3430  ;;  %1169 = vperm.xlu0 %3298, %v4215_v3   ;;  %3450 = vpow2.f32 %v1086_v40 }
 0x2ce   :  { %1172 = vperm.xlu1 %3299, %v4218_v54   ;;  %v4225_v29 = vpop.eup %3432  ;;  %3452 = vpow2.f32 %v1088_v6 }
 0x2cf   :  { %v4228_v22 = vpop.eup %3434  ;;  %3454 = vpow2.f32 %v1092_v10 }
 0x2d0   :  { %v4231_v15 = vpop.eup %3436 }
 0x2d1   :  { %1196 = vperm.xlu0 %3298, %v4231_v15   ;;  %v4235_v51 = vpop.eup %3438 }
 0x2d2   :  { %1175 = vperm.xlu1 %3299, %v4225_v29   ;;  %v4238_v46 = vpop.eup %3440 }
 0x2d3   :  { %v4242_v0 = vpop.eup %3442 }
 0x2d4   :  { %v4245_v35 = vpop.eup %3444 }
 0x2d5   :  { %1202 = vperm.xlu0 %3298, %v4238_v46   ;;  %v4254_v32 = vpop.eup %3446 }
 0x2d6   :  { %1178 = vperm.xlu1 %3299, %v4228_v22   ;;  %v4256_v62 = vpop.eup %3448 }
 0x2d7   :  { %v4264_v16 = vpop.eup %3450 }
 0x2d8   :  { %v4270_v12 = vpop.eup %3452 }
 0x2d9   :  { %1208 = vperm.xlu0 %3298, %v4245_v35   ;;  %v4276_v10 = vpop.eup %3454 }
 0x2da   :  { %1181 = vperm.xlu1 %3299, %v4235_v51  }
 0x2dd   :  { %1214 = vperm.xlu0 %3298, %v4254_v32  }
 0x2de   :  { %1184 = vperm.xlu1 %3299, %v4242_v0  }
 0x2df   :  { %v957_v58 = vpop.xlane.xlu1 %956 }
 0x2e0   :  { %v995_v57 = vrot.slane %v957_v58, %v3850_v33  ;;  %v999_v43 = vrot.slane %v957_v58, %v3857_v36  ;;  %v1003_v48 = vrot.slane %v957_v58, %v4184_v25  ;;  %v1011_v4 = vrot.slane %v957_v58, %v4178_v63 }
 0x2e2   :  { %v1057_v41 = vsub.f32 %v4110_v61, %v995_v57  ;;  %v1059_v31 = vsub.f32 %v4114_v27, %v999_v43  ;;  %1187 = vperm.xlu1 %3299, %v4256_v62   ;;  %v1007_v61 = vrot.slane %v957_v58, %v4207_v5  ;;  %v1061_v23 = vsub.f32 %v4118_v21, %v1003_v48 }
 0x2e3   :  { %v1100_v27 = vmul.f32 1.442695, %v1054_v26  ;;  %v1056_v40 = vsub.f32 %v4108_v11, %v995_v57  ;;  %v1058_v21 = vsub.f32 %v4112_v52, %v999_v43  ;;  %v1065_v11 = vsub.f32 %v4098_v47, %v1011_v4 }
 0x2e4   :  { %v1106_v17 = vmul.f32 1.442695, %v1057_v41  ;;  %v1110_v20 = vmul.f32 1.442695, %v1059_v31  ;;  %v1063_v13 = vsub.f32 %v4142_v39, %v1007_v61  ;;  %v1114_v6 = vmul.f32 1.442695, %v1061_v23 }
 0x2e5   :  { %v1104_v42 = vmul.f32 1.442695, %v1056_v40  ;;  %v1015_v41 = vrot.slane %v957_v58, %v4187_v8  ;;  %v1060_v39 = vsub.f32 %v4116_v56, %v1003_v48  ;;  %v1108_v31 = vmul.f32 1.442695, %v1058_v21 }
 0x2e6   :  { %3456 = vpow2.f32 %v1106_v17  ;;  %1190 = vperm.xlu1 %3299, %v4264_v16   ;;  %v1118_v57 = vmul.f32 1.442695, %v1063_v13  ;;  %v1019_v52 = vrot.slane %v957_v58, %v4192_v37  ;;  %v1122_v47 = vmul.f32 1.442695, %v1065_v11 }
 0x2e7   :  { %3458 = vpow2.f32 %v1096_v34  ;;  %v1067_v43 = vsub.f32 %v4104_v59, %v1015_v41  ;;  %v1062_v17 = vsub.f32 %v4128_v7, %v1007_v61  ;;  %v1112_v56 = vmul.f32 1.442695, %v1060_v39 }
 0x2e8   :  { %3460 = vpow2.f32 %v1110_v20  ;;  %v1023_v20 = vrot.slane %v957_v58, %v4199_v38  ;;  %v1064_v40 = vsub.f32 %v4083_v28, %v1011_v4 }
 0x2e9   :  { %3462 = vpow2.f32 %v1100_v27  ;;  %v1069_v27 = vsub.f32 %v4106_v18, %v1019_v52  ;;  %v1126_v59 = vmul.f32 1.442695, %v1067_v43  ;;  %v1116_v7 = vmul.f32 1.442695, %v1062_v17 }
 0x2ea   :  { %1193 = vperm.xlu1 %3299, %v4270_v12   ;;  %3464 = vpow2.f32 %v1114_v6  ;;  %v1071_v6 = vsub.f32 %v4164_v14, %v1023_v20  ;;  %v1066_v18 = vsub.f32 %v4096_v30, %v1015_v41  ;;  %v1120_v21 = vmul.f32 1.442695, %v1064_v40 }
 0x2eb   :  { %3466 = vpow2.f32 %v1104_v42  ;;  %v1130_v58 = vmul.f32 1.442695, %v1069_v27  ;;  %v1068_v14 = vsub.f32 %v4102_v9, %v1019_v52  ;;  %v1070_v30 = vsub.f32 %v4144_v24, %v1023_v20 }
 0x2ec   :  { %3468 = vpow2.f32 %v1118_v57  ;;  %v1134_v4 = vmul.f32 1.442695, %v1071_v6  ;;  %v1124_v11 = vmul.f32 1.442695, %v1066_v18 }
 0x2ed   :  { %3470 = vpow2.f32 %v1108_v31  ;;  %v1128_v41 = vmul.f32 1.442695, %v1068_v14  ;;  %v1132_v9 = vmul.f32 1.442695, %v1070_v30 }
 0x2ee   :  { %1199 = vperm.xlu1 %3299, %v4276_v10   ;;  %3472 = vpow2.f32 %v1122_v47 }
 0x2ef   :  { %3474 = vpow2.f32 %v1112_v56 }
 0x2f0   :  { %v4282_v26 = vpop.eup %3456  ;;  %3476 = vpow2.f32 %v1126_v59 }
 0x2f1   :  { %v4284_v34 = vpop.eup %3458  ;;  %1220 = vperm.xlu0 %3298, %v4282_v26   ;;  %3478 = vpow2.f32 %v1116_v7 }
 0x2f2   :  { %1205 = vperm.xlu1 %3299, %v4284_v34   ;;  %v4291_v48 = vpop.eup %3460  ;;  %3480 = vpow2.f32 %v1130_v58 }
 0x2f3   :  { %v4293_v23 = vpop.eup %3462  ;;  %3482 = vpow2.f32 %v1120_v21 }
 0x2f4   :  { %v4300_v61 = vpop.eup %3464  ;;  %3484 = vpow2.f32 %v1134_v4 }
 0x2f5   :  { %1226 = vperm.xlu0 %3298, %v4291_v48   ;;  %v4302_v13 = vpop.eup %3466  ;;  %3486 = vpow2.f32 %v1124_v11 }
 0x2f6   :  { %1211 = vperm.xlu1 %3299, %v4293_v23   ;;  %v4308_v42 = vpop.eup %3468  ;;  %3488 = vpow2.f32 %v1128_v41 }
 0x2f7   :  { %v4310_v28 = vpop.eup %3470  ;;  %3490 = vpow2.f32 %v1132_v9 }
 0x2f8   :  { %v4315_v57 = vpop.eup %3472 }
 0x2f9   :  { %1232 = vperm.xlu0 %3298, %v4300_v61   ;;  %v4317_v39 = vpop.eup %3474 }
 0x2fa   :  { %1217 = vperm.xlu1 %3299, %v4302_v13   ;;  %v4322_v31 = vpop.eup %3476 }
 0x2fb   :  { %v4324_v43 = vpop.eup %3478 }
 0x2fc   :  { %v4328_v52 = vpop.eup %3480 }
 0x2fd   :  { %1238 = vperm.xlu0 %3298, %v4308_v42   ;;  %4666 = vst [vmem:[#allocation34_spill] sm:$0xff] %v4328_v52  ;;  %v4330_v47 = vpop.eup %3482 }
 0x2fe   :  { %1223 = vperm.xlu1 %3299, %v4310_v28   ;;  %v4334_v24 = vpop.eup %3484 }
 0x2ff   :  { %4667 = vst [vmem:[#allocation35_spill] sm:$0xff] %v4334_v24  ;;  %v4336_v17 = vpop.eup %3486 }
 0x300   :  { %v4340_v56 = vpop.eup %3488 }
 0x301   :  { %1244 = vperm.xlu0 %3298, %v4315_v57   ;;  %v4343_v20 = vpop.eup %3490 }
 0x302   :  { %1229 = vperm.xlu1 %3299, %v4317_v39   ;;  %4668 = vst [vmem:[#allocation36_spill] sm:$0xff] %v4343_v20 }
 0x305   :  { %1250 = vperm.xlu0 %3298, %v4322_v31  }
 0x306   :  { %1235 = vperm.xlu1 %3299, %v4324_v43  }
 0x309   :  { %1256 = vperm.xlu0 %3298, %v4328_v52  }
 0x30a   :  { %1241 = vperm.xlu1 %3299, %v4330_v47  }
 0x30d   :  { %1262 = vperm.xlu0 %3298, %v4334_v24  }
 0x30e   :  { %1247 = vperm.xlu1 %3299, %v4336_v17  }
 0x312   :  { %1253 = vperm.xlu1 %3299, %v4340_v56  }
 0x316   :  { %1259 = vperm.xlu1 %3299, %v4343_v20  }
 0x34c   :  { %v1170_v40 = vpop.permute.xlu0 %1169 }
 0x34d   :  { %v1173_v27 = vpop.permute.xlu1 %1172  ;;  %v1267_v53 = vrot.slane %v1170_v40, %v4038_v19 }
 0x34e   :  { %v1271_v55 = vrot.slane %v1173_v27, %v4033_v60 }
 0x350   :  { %v1197_v58 = vpop.permute.xlu0 %1196 }
 0x351   :  { %v1176_v59 = vpop.permute.xlu1 %1175  ;;  %v1307_v52 = vrot.slane %v1197_v58, %v4033_v60 }
 0x352   :  { %v1276_v49 = vrot.slane %v1176_v59, %v4038_v19  ;;  %v1272_v59 = vsel %vm791_vm0, %v1271_v55, %v1267_v53 }
 0x354   :  { %v1203_v21 = vpop.permute.xlu0 %1202 }
 0x355   :  { %v1179_v7 = vpop.permute.xlu1 %1178 }
 0x356   :  { %v1280_v41 = vrot.slane %v1179_v7, %v4033_v60 }
 0x358   :  { %v1209_v11 = vpop.permute.xlu0 %1208  ;;  %v1281_v24 = vsel %vm791_vm0, %v1280_v41, %v1276_v49 }
 0x359   :  { %v1182_v6 = vpop.permute.xlu1 %1181  ;;  %v1408_v49 = vsel %vm928_vm1, %v1281_v24, %v1272_v59 }
 0x35a   :  { %v1285_v44 = vrot.slane %v1182_v6, %v4038_v19 }
 0x35c   :  { %v1215_v9 = vpop.permute.xlu0 %1214 }
 0x35d   :  { %v1185_v18 = vpop.permute.xlu1 %1184 }
 0x35e   :  { %v1289_v1 = vrot.slane %v1185_v18, %v4033_v60 }
 0x360   :  { %v1290_v40 = vsel %vm791_vm0, %v1289_v1, %v1285_v44 }
 0x361   :  { %v1188_v4 = vpop.permute.xlu1 %1187  ;;  %v1409_v41 = vsel %vm930_vm2, %v1290_v40, %v1408_v49 }
 0x362   :  { %v1294_v7 = vrot.slane %v1188_v4, %v4038_v19  ;;  %v1325_v4 = vrot.slane %v1209_v11, %v4033_v60 }
 0x365   :  { %v1191_v14 = vpop.permute.xlu1 %1190 }
 0x366   :  { %v1298_v50 = vrot.slane %v1191_v14, %v4033_v60  ;;  %v1316_v14 = vrot.slane %v1203_v21, %v4033_v60 }
 0x368   :  { %v1299_v6 = vsel %vm791_vm0, %v1298_v50, %v1294_v7  ;;  %v1334_v50 = vrot.slane %v1215_v9, %v4033_v60 }
 0x369   :  { %v1194_v30 = vpop.permute.xlu1 %1193  ;;  %v1410_v1 = vsel %vm932_vm3, %v1299_v6, %v1409_v41 }
 0x36a   :  { %v1303_v45 = vrot.slane %v1194_v30, %v4038_v19 }
 0x36d   :  { %v1200_v2 = vpop.permute.xlu1 %1199 }
 0x36e   :  { %v1312_v20 = vrot.slane %v1200_v2, %v4038_v19  ;;  %v1308_v2 = vsel %vm791_vm0, %v1307_v52, %v1303_v45 }
 0x36f   :  { %v1411_v21 = vsel %vm934_vm4, %v1308_v2, %v1410_v1 }
 0x370   :  { %v1221_v18 = vpop.permute.xlu0 %1220  ;;  %v1317_v58 = vsel %vm791_vm0, %v1316_v14, %v1312_v20 }
 0x371   :  { %v1206_v27 = vpop.permute.xlu1 %1205  ;;  %v1412_v11 = vsel %vm936_vm5, %v1317_v58, %v1411_v21 }
 0x372   :  { %v1321_v30 = vrot.slane %v1206_v27, %v4038_v19 }
 0x374   :  { %v1227_v44 = vpop.permute.xlu0 %1226  ;;  %v1326_v53 = vsel %vm791_vm0, %v1325_v4, %v1321_v30 }
 0x375   :  { %v1212_v55 = vpop.permute.xlu1 %1211  ;;  %v1413_v52 = vsel %vm938_vm6, %v1326_v53, %v1412_v11  ;;  %v1352_v53 = vrot.slane %v1227_v44, %v4033_v60  ;;  %v1343_v11 = vrot.slane %v1221_v18, %v4033_v60 }
 0x376   :  { %v1330_v24 = vrot.slane %v1212_v55, %v4038_v19 }
 0x378   :  { %v1233_v7 = vpop.permute.xlu0 %1232  ;;  %v1335_v45 = vsel %vm791_vm0, %v1334_v50, %v1330_v24 }
 0x379   :  { %v1218_v20 = vpop.permute.xlu1 %1217  ;;  %v1414_v40 = vsel %vm940_vm7, %v1335_v45, %v1413_v52  ;;  %v1361_v21 = vrot.slane %v1233_v7, %v4033_v60 }
 0x37a   :  { %v1424_v27 = vsel %vm951_vm8, %v1414_v40, 0.0  ;;  %v1339_v55 = vrot.slane %v1218_v20, %v4038_v19 }
 0x37b   :  { %1425 = vadd.xlane.f32.xlu1 %v1424_v27 }
 0x37c   :  { %v1239_v59 = vpop.permute.xlu0 %1238  ;;  %v1344_v20 = vsel %vm791_vm0, %v1343_v11, %v1339_v55 }
 0x37d   :  { %v1224_v14 = vpop.permute.xlu1 %1223  ;;  %v1370_v45 = vrot.slane %v1239_v59, %v4033_v60 }
 0x37e   :  { %v1348_v2 = vrot.slane %v1224_v14, %v4038_v19 }
 0x380   :  { %v1245_v9 = vpop.permute.xlu0 %1244  ;;  %v1353_v52 = vsel %vm791_vm0, %v1352_v53, %v1348_v2 }
 0x381   :  { %v1230_v6 = vpop.permute.xlu1 %1229  ;;  %v1379_v27 = vrot.slane %v1245_v9, %v4033_v60  ;;  %v1415_v18 = vsel %vm928_vm1, %v1353_v52, %v1344_v20 }
 0x382   :  { %v1357_v41 = vrot.slane %v1230_v6, %v4038_v19 }
 0x384   :  { %v1251_v49 = vpop.permute.xlu0 %1250  ;;  %v1362_v44 = vsel %vm791_vm0, %v1361_v21, %v1357_v41 }
 0x385   :  { %v1236_v30 = vpop.permute.xlu1 %1235  ;;  %v1388_v6 = vrot.slane %v1251_v49, %v4033_v60  ;;  %v1416_v9 = vsel %vm930_vm2, %v1362_v44, %v1415_v18 }
 0x386   :  { %v1366_v50 = vrot.slane %v1236_v30, %v4038_v19 }
 0x388   :  { %v1257_v58 = vpop.permute.xlu0 %1256  ;;  %v1371_v7 = vsel %vm791_vm0, %v1370_v45, %v1366_v50 }
 0x389   :  { %v1242_v4 = vpop.permute.xlu1 %1241  ;;  %v1397_v59 = vrot.slane %v1257_v58, %v4033_v60 }
 0x38a   :  { %v1375_v24 = vrot.slane %v1242_v4, %v4038_v19 }
 0x38c   :  { %v1380_v4 = vsel %vm791_vm0, %v1379_v27, %v1375_v24  ;;  %v1263_v2 = vpop.permute.xlu0 %1262 }
 0x38d   :  { %v1248_v1 = vpop.permute.xlu1 %1247  ;;  %v1406_v50 = vrot.slane %v1263_v2, %v4033_v60 }
 0x38e   :  { %v1384_v40 = vrot.slane %v1248_v1, %v4038_v19  ;;  %v1417_v1 = vsel %vm932_vm3, %v1371_v7, %v1416_v9 }
 0x38f   :  { %v1418_v55 = vsel %vm934_vm4, %v1380_v4, %v1417_v1  ;;  %v3660_v1 = vmov 0.0  }
 0x390   :  { %v1389_v41 = vsel %vm791_vm0, %v1388_v6, %v1384_v40  ;;  %1643 = vmatprep.mubr.f32.mxu1 %v3660_v1 }
 0x391   :  { %v1254_v14 = vpop.permute.xlu1 %1253  ;;  %v1419_v58 = vsel %vm936_vm5, %v1389_v41, %v1418_v55 }
 0x392   :  { %v1393_v30 = vrot.slane %v1254_v14, %v4038_v19 }
 0x394   :  { %v1398_v53 = vsel %vm791_vm0, %v1397_v59, %v1393_v30 }
 0x395   :  { %v1260_v49 = vpop.permute.xlu1 %1259  ;;  %v1420_v11 = vsel %vm938_vm6, %v1398_v53, %v1419_v58 }
 0x396   :  { %v1402_v21 = vrot.slane %v1260_v49, %v4038_v19 }
 0x398   :  { %v1407_v24 = vsel %vm791_vm0, %v1406_v50, %v1402_v21 }
 0x399   :  { %v1421_v45 = vsel %vm940_vm7, %v1407_v24, %v1420_v11 }
 0x39a   :  { %v1427_v52 = vsel %vm951_vm8, %v1421_v45, 0.0 }
 0x39b   :  { %1428 = vadd.xlane.f32.xlu0 %v1427_v52 }
 0x408   :  { %v1426_v40 = vpop.xlane.xlu1 %1425 }
 0x409   :  { %v1435_v27 = vrot.slane %v1426_v40, %v3850_v33  ;;  %v1439_v44 = vrot.slane %v1426_v40, %v3857_v36  ;;  %v1443_v14 = vrot.slane %v1426_v40, %v4184_v25  ;;  %v1447_v20 = vrot.slane %v1426_v40, %v4207_v5 }
 0x40a   :  { %v1451_v7 = vrot.slane %v1426_v40, %v4178_v63  ;;  %v1455_v4 = vrot.slane %v1426_v40, %v4187_v8 }
 0x40b   :  { %3492 = vrcp.f32 %v1435_v27 }
 0x40c   :  { %3494 = vrcp.f32 %v1439_v44 }
 0x40d   :  { %3496 = vrcp.f32 %v1443_v14 }
 0x40e   :  { %3498 = vrcp.f32 %v1447_v20 }
 0x40f   :  { %3500 = vrcp.f32 %v1451_v7 }
 0x410   :  { %3502 = vrcp.f32 %v1455_v4 }
 0x415   :  { %v3493_v6 = vpop.eup %3492 }
 0x416   :  { %v1514_v30 = vmul.f32 %v3493_v6, %v4218_v54  ;;  %v1513_v18 = vmul.f32 %v3493_v6, %v4215_v3  ;;  %v3495_v59 = vpop.eup %3494  ;;  %v1459_v54 = vrot.slane %v1426_v40, %v4192_v37 }
 0x417   :  { %v1516_v2 = vmul.f32 %v3495_v59, %v4225_v29  ;;  %v1517_v9 = vmul.f32 %v3495_v59, %v4228_v22  ;;  %v3497_v41 = vpop.eup %3496  ;;  %v1463_v29 = vrot.slane %v1426_v40, %v4199_v38 }
 0x418   :  { %1566 = vperm.xlu1 %3299, %v1514_v30   ;;  %1563 = vperm.xlu0 %3298, %v1513_v18   ;;  %v1519_v3 = vmul.f32 %v3497_v41, %v4235_v51  ;;  %v1520_v53 = vmul.f32 %v3497_v41, %v4242_v0  ;;  %v3499_v49 = vpop.eup %3498  ;;  %3504 = vrcp.f32 %v1459_v54 }
 0x419   :  { %v1522_v22 = vmul.f32 %v3499_v49, %v4256_v62  ;;  %v1523_v55 = vmul.f32 %v3499_v49, %v4264_v16  ;;  %v3501_v50 = vpop.eup %3500  ;;  %3506 = vrcp.f32 %v1463_v29  ;;  %v4673_v49 = vld [vmem:[#allocation12_spill] sm:$0xff] }
 0x41a   :  { %v1525_v21 = vmul.f32 %v3501_v50, %v4270_v12  ;;  %v1526_v51 = vmul.f32 %v3501_v50, %v4231_v15  ;;  %v3503_v58 = vpop.eup %3502  ;;  %v3525_v50 = vld [vmem:[#allocation5 + $0x78] sm:$0xff] }
 0x41b   :  { %v1528_v62 = vmul.f32 %v3503_v58, %v4276_v10  ;;  %v1529_v16 = vmul.f32 %v3503_v58, %v4238_v46  ;;  %v4676_v58 = vld [vmem:[#allocation14_spill] sm:$0xff] }
 0x41c   :  { %1653 = vperm.xlu1 %3299, %v1516_v2   ;;  %1656 = vperm.xlu0 %3298, %v1517_v9  }
 0x420   :  { %1743 = vperm.xlu1 %3299, %v1519_v3   ;;  %1746 = vperm.xlu0 %3298, %v1520_v53   ;;  %v4672_v53 = vld [vmem:[#allocation13_spill] sm:$0xff] }
 0x421   :  { %v4674_v29 = vpack.c.bf16 %v4672_v53, %v4673_v49  ;;  %v3543_v53 = vld [vmem:[#allocation5 + $0xf0] sm:$0xff] }
 0x422   :  { %v3505_v45 = vpop.eup %3504 }
 0x423   :  { %v1531_v15 = vmul.f32 %v3505_v45, %v4284_v34  ;;  %v1532_v52 = vmul.f32 %v3505_v45, %v4245_v35  ;;  %v3507_v40 = vpop.eup %3506  ;;  %v3527_v45 = vld [vmem:[#allocation5 + $0x70] sm:$0xff] }
 0x424   :  { %1833 = vperm.xlu1 %3299, %v1522_v22   ;;  %1836 = vperm.xlu0 %3298, %v1523_v55   ;;  %v1535_v46 = vmul.f32 %v3507_v40, %v4254_v32  ;;  %v3524_v55 = vld [vmem:[#allocation5 + $0x68] sm:$0xff] }
 0x428   :  { %v1429_v0 = vpop.xlane.xlu0 %1428  ;;  %1923 = vperm.xlu1 %3299, %v1525_v21   ;;  %1926 = vperm.xlu0 %3298, %v1526_v51   ;;  %v3206_v21 = vpack.c.bf16 %v3525_v50, %v3524_v55  ;;  %v4675_v51 = vld [vmem:[#allocation15_spill] sm:$0xff]  ;;  %v3544_v55 = vld [vmem:[#allocation5 + $0x108] sm:$0xff] }
 0x429   :  { %v1467_v24 = vrot.slane %v1429_v0, %v3850_v33  ;;  %v1471_v11 = vrot.slane %v1429_v0, %v3857_v36  ;;  %v1475_v12 = vrot.slane %v1429_v0, %v4184_v25  ;;  %v1479_v33 = vrot.slane %v1429_v0, %v4207_v5  ;;  %v3545_v50 = vld [vmem:[#allocation5 + $0x118] sm:$0xff] }
 0x42a   :  { %v1534_v36 = vmul.f32 %v3507_v40, %v4293_v23  ;;  %v1483_v25 = vrot.slane %v1429_v0, %v4178_v63  ;;  %v1487_v5 = vrot.slane %v1429_v0, %v4187_v8  ;;  %v1491_v63 = vrot.slane %v1429_v0, %v4192_v37  ;;  %v4679_v40 = vld [vmem:[#allocation16_spill] sm:$0xff] }
 0x42b   :  { %3508 = vrcp.f32 %v1467_v24  ;;  %v1495_v8 = vrot.slane %v1429_v0, %v4199_v38  ;;  %v4677_v0 = vpack.c.bf16 %v4675_v51, %v4676_v58 }
 0x42c   :  { %2013 = vperm.xlu1 %3299, %v1528_v62   ;;  %2016 = vperm.xlu0 %3298, %v1529_v16   ;;  %3510 = vrcp.f32 %v1471_v11  ;;  %v3526_v16 = vld [vmem:[#allocation5 + $0x60] sm:$0xff] }
 0x42d   :  { %3512 = vrcp.f32 %v1475_v12  ;;  %v3208_v12 = vpack.c.bf16 %v3527_v45, %v3526_v16 }
 0x42e   :  { %3514 = vrcp.f32 %v1479_v33 }
 0x42f   :  { %3516 = vrcp.f32 %v1483_v25 }
 0x430   :  { %2103 = vperm.xlu1 %3299, %v1531_v15   ;;  %2106 = vperm.xlu0 %3298, %v1532_v52   ;;  %3518 = vrcp.f32 %v1487_v5  ;;  %v4678_v52 = vld [vmem:[#allocation17_spill] sm:$0xff]  ;;  %v3530_v5 = vld [vmem:[#allocation5 + $0x80] sm:$0xff] }
 0x431   :  { %3520 = vrcp.f32 %v1491_v63  ;;  %v4680_v33 = vpack.c.bf16 %v4678_v52, %v4679_v40 }
 0x432   :  { %3522 = vrcp.f32 %v1495_v8 }
 0x434   :  { %2193 = vperm.xlu1 %3299, %v1534_v36   ;;  %2196 = vperm.xlu0 %3298, %v1535_v46   ;;  %v3528_v46 = vld [vmem:[#allocation5 + $0x88] sm:$0xff] }
 0x435   :  { %v3509_v10 = vpop.eup %3508 }
 0x436   :  { %v1537_v34 = vmul.f32 %v3509_v10, %v4302_v13  ;;  %v1538_v35 = vmul.f32 %v3509_v10, %v4282_v26  ;;  %v3511_v27 = vpop.eup %3510  ;;  %v3529_v10 = vld [vmem:[#allocation5 + $0x98] sm:$0xff] }
 0x437   :  { %v1540_v23 = vmul.f32 %v3511_v27, %v4310_v28  ;;  %v1541_v32 = vmul.f32 %v3511_v27, %v4291_v48  ;;  %v3513_v44 = vpop.eup %3512  ;;  %v3210_v25 = vpack.c.bf16 %v3529_v10, %v3528_v46  ;;  %v3550_v46 = vld [vmem:[#allocation5 + $0x120] sm:$0xff]  ;;  %v3551_v10 = vld [vmem:[#allocation5 + $0x130] sm:$0xff] }
 0x438   :  { %2283 = vperm.xlu1 %3299, %v1537_v34   ;;  %2286 = vperm.xlu0 %3298, %v1538_v35   ;;  %v1543_v13 = vmul.f32 %v3513_v44, %v4317_v39  ;;  %v1544_v26 = vmul.f32 %v3513_v44, %v4300_v61  ;;  %v3515_v14 = vpop.eup %3514 }
 0x439   :  { %v1546_v28 = vmul.f32 %v3515_v14, %v4324_v43  ;;  %v1547_v48 = vmul.f32 %v3515_v14, %v4308_v42  ;;  %v3517_v20 = vpop.eup %3516  ;;  %v4669_v43 = vld [vmem:[#allocation34_spill] sm:$0xff] }
 0x43a   :  { %v1549_v37 = vmul.f32 %v3517_v20, %v4330_v47  ;;  %v1550_v39 = vmul.f32 %v3517_v20, %v4315_v57  ;;  %v3519_v6 = vpop.eup %3518  ;;  %v4670_v47 = vld [vmem:[#allocation36_spill] sm:$0xff]  ;;  %v4671_v57 = vld [vmem:[#allocation35_spill] sm:$0xff] }
 0x43b   :  { %v1552_v61 = vmul.f32 %v3519_v6, %v4336_v17  ;;  %v1553_v7 = vmul.f32 %v3519_v6, %v4322_v31  ;;  %v3521_v38 = vpop.eup %3520  ;;  %v3534_v20 = vld [vmem:[#allocation5 + $0xa0] sm:$0xff] }
 0x43c   :  { %2373 = vperm.xlu1 %3299, %v1540_v23   ;;  %2376 = vperm.xlu0 %3298, %v1541_v32   ;;  %v1555_v42 = vmul.f32 %v3521_v38, %v4340_v56  ;;  %v1556_v30 = vmul.f32 %v3521_v38, %v4669_v43  ;;  %v3523_v18 = vpop.eup %3522  ;;  %v3531_v23 = vld [vmem:[#allocation5 + $0x90] sm:$0xff]  ;;  %v3537_v38 = vld [vmem:[#allocation5 + $0xd8] sm:$0xff] }
 0x43d   :  { %v1558_v59 = vmul.f32 %v3523_v18, %v4670_v47  ;;  %v1559_v4 = vmul.f32 %v3523_v18, %v4671_v57  ;;  %v3212_v32 = vpack.c.bf16 %v3531_v23, %v3530_v5  ;;  %v3538_v47 = vld [vmem:[#allocation5 + $0xc0] sm:$0xff]  ;;  %v3553_v5 = vld [vmem:[#allocation5 + $0x158] sm:$0xff] }
 0x440   :  { %2463 = vperm.xlu1 %3299, %v1543_v13   ;;  %2466 = vperm.xlu0 %3298, %v1544_v26   ;;  %v3532_v13 = vld [vmem:[#allocation5 + $0xa8] sm:$0xff]  ;;  %v3533_v26 = vld [vmem:[#allocation5 + $0xb8] sm:$0xff] }
 0x441   :  { %v3214_v14 = vpack.c.bf16 %v3533_v26, %v3532_v13  ;;  %v3554_v13 = vld [vmem:[#allocation5 + $0x140] sm:$0xff]  ;;  %v3555_v26 = vld [vmem:[#allocation5 + $0x150] sm:$0xff] }
 0x444   :  { %2553 = vperm.xlu1 %3299, %v1546_v28   ;;  %2556 = vperm.xlu0 %3298, %v1547_v48  }
 0x448   :  { %2643 = vperm.xlu1 %3299, %v1549_v37   ;;  %2646 = vperm.xlu0 %3298, %v1550_v39   ;;  %v3535_v37 = vld [vmem:[#allocation5 + $0xb0] sm:$0xff] }
 0x449   :  { %v3216_v39 = vpack.c.bf16 %v3535_v37, %v3534_v20  ;;  %v3557_v20 = vld [vmem:[#allocation5 + $0x178] sm:$0xff] }
 0x44c   :  { %2733 = vperm.xlu1 %3299, %v1552_v61   ;;  %2736 = vperm.xlu0 %3298, %v1553_v7   ;;  %v3536_v7 = vld [vmem:[#allocation5 + $0xc8] sm:$0xff] }
 0x450   :  { %2823 = vperm.xlu1 %3299, %v1555_v42   ;;  %2826 = vperm.xlu0 %3298, %v1556_v30   ;;  %v3218_v42 = vpack.c.bf16 %v3537_v38, %v3536_v7  ;;  %v3558_v7 = vld [vmem:[#allocation5 + $0x160] sm:$0xff]  ;;  %v3559_v38 = vld [vmem:[#allocation5 + $0x170] sm:$0xff] }
 0x454   :  { %2913 = vperm.xlu1 %3299, %v1558_v59   ;;  %2916 = vperm.xlu0 %3298, %v1559_v4   ;;  %v3539_v59 = vld [vmem:[#allocation5 + $0xd0] sm:$0xff] }
 0x455   :  { %v3220_v57 = vpack.c.bf16 %v3539_v59, %v3538_v47 }
 0x497   :  { %v1567_v2 = vpop.permute.xlu1 %1566  ;;  %v1564_v17 = vpop.permute.xlu0 %1563 }
 0x498   :  { %v1575_v31 = vrot.slane %v1567_v2, %v4033_v60  ;;  %v1571_v9 = vrot.slane %v1564_v17, %v4038_v19  ;;  %v3540_v17 = vld [vmem:[#allocation5 + $0xe8] sm:$0xff] }
 0x49a   :  { %v1576_v41 = vsel %vm791_vm0, %v1575_v31, %v1571_v9  ;;  %v3541_v31 = vld [vmem:[#allocation5 + $0xf8] sm:$0xff] }
 0x49b   :  { %v1654_v56 = vpop.permute.xlu1 %1653  ;;  %3114 = vmatmul.mubr.msk.f32.vlgmr.msra.gmra.mrb[16].mxu1 %vm951_vm8, %v1576_v41  ;;  %v1657_v54 = vpop.permute.xlu0 %1656  ;;  %v3222_v9 = vpack.c.bf16 %v3541_v31, %v3540_v17  ;;  %v4682_v17 = vld [vmem:[#allocation18_spill] sm:$0xff] }
 0x49c   :  { %v1661_v3 = vrot.slane %v1654_v56, %v4038_v19  ;;  %3201 = vmatpush1.bf16.msra.mxu1 %v4674_v29  ;;  %v1665_v22 = vrot.slane %v1657_v54, %v4033_v60  ;;  %1733 = vmatprep.mubr.f32.mxu1 %v3660_v1 }
 0x49d   :  { %3203 = vmatprep.subr.bf16.mxu1 %v4677_v0 }
 0x49e   :  { %v1666_v24 = vsel %vm791_vm0, %v1665_v22, %v1661_v3  ;;  %v3542_v3 = vld [vmem:[#allocation5 + $0xe0] sm:$0xff] }
 0x49f   :  { %v1744_v11 = vpop.permute.xlu1 %1743  ;;  %3115 = vmatmul.mubr.msk.f32.vlgmr.msra.gmra.mrb[18].mxu1 %vm951_vm8, %v1666_v24  ;;  %v1747_v62 = vpop.permute.xlu0 %1746  ;;  %v3224_v49 = vpack.c.bf16 %v3543_v53, %v3542_v3  ;;  %v3546_v24 = vld [vmem:[#allocation5 + $0x100] sm:$0xff]  ;;  %v4684_v3 = vld [vmem:[#allocation21_spill] sm:$0xff] }
 0x4a0   :  { %v1751_v15 = vrot.slane %v1744_v11, %v4038_v19  ;;  %3205 = vmatpush1.bf16.msra.mxu1 %v4680_v33  ;;  %v1755_v36 = vrot.slane %v1747_v62, %v4033_v60  ;;  %1823 = vmatprep.mubr.f32.mxu1 %v3660_v1  ;;  %v3547_v11 = vld [vmem:[#allocation5 + $0x110] sm:$0xff]  ;;  %v4685_v53 = vld [vmem:[#allocation20_spill] sm:$0xff] }
 0x4a1   :  { %3207 = vmatprep.subr.bf16.mxu1 %v3206_v21  ;;  %v3226_v21 = vpack.c.bf16 %v3545_v50, %v3544_v55  ;;  %v3228_v62 = vpack.c.bf16 %v3547_v11, %v3546_v24  ;;  %v4688_v55 = vld [vmem:[#allocation22_spill] sm:$0xff]  ;;  %v4690_v24 = vld [vmem:[#allocation25_spill] sm:$0xff]  ;;  %v4691_v11 = vld [vmem:[#allocation24_spill] sm:$0xff] }
 0x4a2   :  { %v1756_v34 = vsel %vm791_vm0, %v1755_v36, %v1751_v15  ;;  %v3549_v15 = vld [vmem:[#allocation5 + $0x138] sm:$0xff] }
 0x4a3   :  { %v1834_v35 = vpop.permute.xlu1 %1833  ;;  %3116 = vmatmul.mubr.msk.f32.vlgmr.msra.gmra.mrb[20].mxu1 %vm951_vm8, %v1756_v34  ;;  %v1837_v27 = vpop.permute.xlu0 %1836 }
 0x4a4   :  { %v1841_v44 = vrot.slane %v1834_v35, %v4038_v19  ;;  %3209 = vmatpush1.bf16.msra.mxu1 %v3208_v12  ;;  %v1845_v63 = vrot.slane %v1837_v27, %v4033_v60  ;;  %1913 = vmatprep.mubr.f32.mxu1 %v3660_v1  ;;  %v3548_v12 = vld [vmem:[#allocation5 + $0x128] sm:$0xff] }
 0x4a5   :  { %3211 = vmatprep.subr.bf16.mxu1 %v3210_v25  ;;  %v3230_v52 = vpack.c.bf16 %v3549_v15, %v3548_v12  ;;  %v3232_v25 = vpack.c.bf16 %v3551_v10, %v3550_v46  ;;  %v3552_v27 = vld [vmem:[#allocation5 + $0x148] sm:$0xff]  ;;  %v4694_v12 = vld [vmem:[#allocation26_spill] sm:$0xff]  ;;  %v4697_v10 = vld [vmem:[#allocation27_spill] sm:$0xff] }
 0x4a6   :  { %v1846_v8 = vsel %vm791_vm0, %v1845_v63, %v1841_v44  ;;  %v3234_v23 = vpack.c.bf16 %v3553_v5, %v3552_v27  ;;  %v4696_v46 = vld [vmem:[#allocation29_spill] sm:$0xff]  ;;  %v4700_v27 = vld [vmem:[#allocation30_spill] sm:$0xff] }
 0x4a7   :  { %v1924_v28 = vpop.permute.xlu1 %1923  ;;  %3117 = vmatmul.mubr.msk.f32.vlgmr.msra.gmra.mrb[22].mxu1 %vm951_vm8, %v1846_v8  ;;  %v1927_v48 = vpop.permute.xlu0 %1926 }
 0x4a8   :  { %v1931_v6 = vrot.slane %v1924_v28, %v4038_v19  ;;  %3213 = vmatpush1.bf16.msra.mxu1 %v3212_v32  ;;  %v1935_v61 = vrot.slane %v1927_v48, %v4033_v60  ;;  %2003 = vmatprep.mubr.f32.mxu1 %v3660_v1  ;;  %v3556_v48 = vld [vmem:[#allocation5 + $0x168] sm:$0xff] }
 0x4a9   :  { %3215 = vmatprep.subr.bf16.mxu1 %v3214_v14  ;;  %v3236_v14 = vpack.c.bf16 %v3555_v26, %v3554_v13  ;;  %v3238_v37 = vpack.c.bf16 %v3557_v20, %v3556_v48  ;;  %v4702_v13 = vld [vmem:[#allocation33_spill] sm:$0xff]  ;;  %v4703_v26 = vld [vmem:[#allocation31_spill] sm:$0xff] }
 0x4aa   :  { %v1936_v43 = vsel %vm791_vm0, %v1935_v61, %v1931_v6 }
 0x4ab   :  { %v2014_v30 = vpop.permute.xlu1 %2013  ;;  %3118 = vmatmul.mubr.msk.f32.vlgmr.msra.gmra.mrb[24].mxu1 %vm951_vm8, %v1936_v43  ;;  %v2017_v18 = vpop.permute.xlu0 %2016 }
 0x4ac   :  { %v2021_v4 = vrot.slane %v2014_v30, %v4038_v19  ;;  %3217 = vmatpush1.bf16.msra.mxu1 %v3216_v39  ;;  %v2025_v2 = vrot.slane %v2017_v18, %v4033_v60  ;;  %2093 = vmatprep.mubr.f32.mxu1 %v3660_v1 }
 0x4ad   :  { %3219 = vmatprep.subr.bf16.mxu1 %v3218_v42  ;;  %v3240_v42 = vpack.c.bf16 %v3559_v38, %v3558_v7 }
 0x4ae   :  { %v2026_v41 = vsel %vm791_vm0, %v2025_v2, %v2021_v4  ;;  %v4681_v2 = vld [vmem:[#allocation19_spill] sm:$0xff] }
 0x4af   :  { %v2104_v56 = vpop.permute.xlu1 %2103  ;;  %3119 = vmatmul.mubr.msk.f32.vlgmr.msra.gmra.mrb[26].mxu1 %vm951_vm8, %v2026_v41  ;;  %v2107_v54 = vpop.permute.xlu0 %2106  ;;  %v4683_v31 = vpack.c.bf16 %v4681_v2, %v4682_v17 }
 0x4b0   :  { %v2111_v29 = vrot.slane %v2104_v56, %v4038_v19  ;;  %3221 = vmatpush1.bf16.msra.mxu1 %v3220_v57  ;;  %v2115_v22 = vrot.slane %v2107_v54, %v4033_v60  ;;  %2183 = vmatprep.mubr.f32.mxu1 %v3660_v1 }
 0x4b1   :  { %3223 = vmatprep.subr.bf16.mxu1 %v3222_v9 }
 0x4b2   :  { %v2116_v51 = vsel %vm791_vm0, %v2115_v22, %v2111_v29  ;;  %v4687_v22 = vld [vmem:[#allocation23_spill] sm:$0xff] }
 0x4b3   :  { %v2194_v58 = vpop.permute.xlu1 %2193  ;;  %3120 = vmatmul.mubr.msk.f32.vlgmr.msra.gmra.mrb[28].mxu1 %vm951_vm8, %v2116_v51  ;;  %v2197_v0 = vpop.permute.xlu0 %2196  ;;  %v4689_v50 = vpack.c.bf16 %v4687_v22, %v4688_v55 }
 0x4b4   :  { %v2201_v16 = vrot.slane %v2194_v58, %v4038_v19  ;;  %3225 = vmatpush1.bf16.msra.mxu1 %v3224_v49  ;;  %v2205_v45 = vrot.slane %v2197_v0, %v4033_v60  ;;  %2273 = vmatprep.mubr.f32.mxu1 %v3660_v1  ;;  %v4686_v49 = vpack.c.bf16 %v4684_v3, %v4685_v53 }
 0x4b5   :  { %3227 = vmatprep.subr.bf16.mxu1 %v3226_v21 }
 0x4b6   :  { %v2206_v40 = vsel %vm791_vm0, %v2205_v45, %v2201_v16  ;;  %v4693_v45 = vld [vmem:[#allocation28_spill] sm:$0xff] }
 0x4b7   :  { %v2284_v33 = vpop.permute.xlu1 %2283  ;;  %3121 = vmatmul.mubr.msk.f32.vlgmr.msra.gmra.mrb[30].mxu1 %vm951_vm8, %v2206_v40  ;;  %v2287_v36 = vpop.permute.xlu0 %2286  ;;  %v4695_v15 = vpack.c.bf16 %v4693_v45, %v4694_v12 }
 0x4b8   :  { %v2291_v34 = vrot.slane %v2284_v33, %v4038_v19  ;;  %3229 = vmatpush1.bf16.msra.mxu1 %v3228_v62  ;;  %v2295_v35 = vrot.slane %v2287_v36, %v4033_v60  ;;  %2363 = vmatprep.mubr.f32.mxu1 %v3660_v1  ;;  %v4692_v62 = vpack.c.bf16 %v4690_v24, %v4691_v11 }
 0x4b9   :  { %3231 = vmatprep.subr.bf16.mxu1 %v3230_v52 }
 0x4ba   :  { %v2296_v32 = vsel %vm791_vm0, %v2295_v35, %v2291_v34  ;;  %v4699_v35 = vld [vmem:[#allocation32_spill] sm:$0xff] }
 0x4bb   :  { %v2374_v44 = vpop.permute.xlu1 %2373  ;;  %3122 = vmatmul.mubr.msk.f32.vlgmr.msra.gmra.mrb[32].mxu1 %vm951_vm8, %v2296_v32  ;;  %v2377_v63 = vpop.permute.xlu0 %2376  ;;  %v4701_v5 = vpack.c.bf16 %v4699_v35, %v4700_v27 }
 0x4bc   :  { %v2381_v8 = vrot.slane %v2374_v44, %v4038_v19  ;;  %3233 = vmatpush1.bf16.msra.mxu1 %v3232_v25  ;;  %v2385_v28 = vrot.slane %v2377_v63, %v4033_v60  ;;  %2453 = vmatprep.mubr.f32.mxu1 %v3660_v1  ;;  %v4698_v25 = vpack.c.bf16 %v4696_v46, %v4697_v10 }
 0x4bd   :  { %3235 = vmatprep.subr.bf16.mxu1 %v3234_v23 }
 0x4be   :  { %v2386_v39 = vsel %vm791_vm0, %v2385_v28, %v2381_v8 }
 0x4bf   :  { %v2464_v6 = vpop.permute.xlu1 %2463  ;;  %3123 = vmatmul.mubr.msk.f32.vlgmr.msra.gmra.mrb[34].mxu1 %vm951_vm8, %v2386_v39  ;;  %v2467_v61 = vpop.permute.xlu0 %2466 }
 0x4c0   :  { %v2471_v43 = vrot.slane %v2464_v6, %v4038_v19  ;;  %3237 = vmatpush1.bf16.msra.mxu1 %v3236_v14  ;;  %v2475_v30 = vrot.slane %v2467_v61, %v4033_v60  ;;  %2543 = vmatprep.mubr.f32.mxu1 %v3660_v1  ;;  %v4704_v14 = vpack.c.bf16 %v4702_v13, %v4703_v26 }
 0x4c1   :  { %3239 = vmatprep.subr.bf16.mxu1 %v3238_v37 }
 0x4c2   :  { %v2476_v18 = vsel %vm791_vm0, %v2475_v30, %v2471_v43 }
 0x4c3   :  { %v2554_v47 = vpop.permute.xlu1 %2553  ;;  %3124 = vmatmul.mubr.msk.f32.vlgmr.msra.gmra.mrb[36].mxu1 %vm951_vm8, %v2476_v18  ;;  %v2557_v59 = vpop.permute.xlu0 %2556 }
 0x4c4   :  { %v2561_v57 = vrot.slane %v2554_v47, %v4038_v19  ;;  %3241 = vmatpush1.bf16.msra.mxu1 %v3240_v42  ;;  %v2565_v4 = vrot.slane %v2557_v59, %v4033_v60  ;;  %2633 = vmatprep.mubr.f32.mxu1 %v3660_v1 }
 0x4c5   :  { %3243 = vmatprep.subr.bf16.mxu1 %v4683_v31 }
 0x4c6   :  { %v2566_v9 = vsel %vm791_vm0, %v2565_v4, %v2561_v57 }
 0x4c7   :  { %v2644_v41 = vpop.permute.xlu1 %2643  ;;  %3125 = vmatmul.mubr.msk.f32.vlgmr.msra.gmra.mrb[38].mxu1 %vm951_vm8, %v2566_v9  ;;  %v2647_v56 = vpop.permute.xlu0 %2646 }
 0x4c8   :  { %v2651_v54 = vrot.slane %v2644_v41, %v4038_v19  ;;  %3245 = vmatpush1.bf16.msra.mxu1 %v4686_v49  ;;  %v2655_v29 = vrot.slane %v2647_v56, %v4033_v60  ;;  %2723 = vmatprep.mubr.f32.mxu1 %v3660_v1 }
 0x4c9   :  { %3247 = vmatprep.subr.bf16.mxu1 %v4689_v50 }
 0x4ca   :  { %v2656_v21 = vsel %vm791_vm0, %v2655_v29, %v2651_v54 }
 0x4cb   :  { %v2734_v51 = vpop.permute.xlu1 %2733  ;;  %3126 = vmatmul.mubr.msk.f32.vlgmr.msra.gmra.mrb[40].mxu1 %vm951_vm8, %v2656_v21  ;;  %v2737_v58 = vpop.permute.xlu0 %2736 }
 0x4cc   :  { %v2741_v0 = vrot.slane %v2734_v51, %v4038_v19  ;;  %3249 = vmatpush1.bf16.msra.mxu1 %v4692_v62  ;;  %v2745_v16 = vrot.slane %v2737_v58, %v4033_v60  ;;  %2813 = vmatprep.mubr.f32.mxu1 %v3660_v1 }
 0x4cd   :  { %3251 = vmatprep.subr.bf16.mxu1 %v4695_v15 }
 0x4ce   :  { %v2746_v52 = vsel %vm791_vm0, %v2745_v16, %v2741_v0 }
 0x4cf   :  { %v2824_v40 = vpop.permute.xlu1 %2823  ;;  %3127 = vmatmul.mubr.msk.f32.vlgmr.msra.gmra.mrb[42].mxu1 %vm951_vm8, %v2746_v52  ;;  %v2827_v33 = vpop.permute.xlu0 %2826 }
 0x4d0   :  { %v2831_v36 = vrot.slane %v2824_v40, %v4038_v19  ;;  %3253 = vmatpush1.bf16.msra.mxu1 %v4698_v25  ;;  %v2835_v34 = vrot.slane %v2827_v33, %v4033_v60  ;;  %2903 = vmatprep.mubr.f32.mxu1 %v3660_v1 }
 0x4d1   :  { %3255 = vmatprep.subr.bf16.mxu1 %v4701_v5 }
 0x4d2   :  { %v2836_v23 = vsel %vm791_vm0, %v2835_v34, %v2831_v36 }
 0x4d3   :  { %v2914_v32 = vpop.permute.xlu1 %2913  ;;  %3128 = vmatmul.mubr.msk.f32.vlgmr.msra.gmra.mrb[44].mxu1 %vm951_vm8, %v2836_v23  ;;  %v2917_v44 = vpop.permute.xlu0 %2916 }
 0x4d4   :  { %v2921_v63 = vrot.slane %v2914_v32, %v4038_v19  ;;  %3257 = vmatpush1.bf16.msra.mxu1 %v4704_v14  ;;  %v2925_v8 = vrot.slane %v2917_v44, %v4033_v60  ;;  %2993 = vmatprep.mubr.f32.mxu1 %v3660_v1 }
 0x4d6   :  { %v2926_v28 = vsel %vm791_vm0, %v2925_v8, %v2921_v63 }
 0x4d7   :  { %3129 = vmatmul.mubr.msk.f32.vlgmr.msra.gmra.mrb[46].mxu1 %vm951_vm8, %v2926_v28 }
 0x56e   :  { %v1645_v48 = vpop.f32.mrb[16].mxu1 }
 0x56f   :  { %v1647_v20 = vpop.f32.mrb[17].mxu1 }
 0x572   :  { %v1735_v37 = vpop.f32.mrb[18].mxu1 }
 0x573   :  { %v3032_v39 = vrot.slane %v1735_v37, 7  ;;  %v1737_v6 = vpop.f32.mrb[19].mxu1 }
 0x574   :  { %v3046_v61 = vrot.slane %v1737_v6, 7 }
 0x575   :  { %v3033_v19 = vsel %vm928_vm1, %v3032_v39, %v1645_v48 }
 0x576   :  { %v3047_v7 = vsel %vm928_vm1, %v3046_v61, %v1647_v20  ;;  %v1825_v38 = vpop.f32.mrb[20].mxu1 }
 0x577   :  { %v3034_v42 = vrot.slane %v1825_v38, 6  ;;  %v1827_v43 = vpop.f32.mrb[21].mxu1 }
 0x578   :  { %v3048_v60 = vrot.slane %v1827_v43, 6 }
 0x579   :  { %v3035_v1 = vsel %vm930_vm2, %v3034_v42, %v3033_v19 }
 0x57a   :  { %v3049_v30 = vsel %vm930_vm2, %v3048_v60, %v3047_v7  ;;  %v1915_v18 = vpop.f32.mrb[22].mxu1 }
 0x57b   :  { %v3036_v47 = vrot.slane %v1915_v18, 5  ;;  %v1917_v59 = vpop.f32.mrb[23].mxu1 }
 0x57c   :  { %v3050_v57 = vrot.slane %v1917_v59, 5 }
 0x57d   :  { %v3037_v4 = vsel %vm932_vm3, %v3036_v47, %v3035_v1 }
 0x57e   :  { %v3051_v2 = vsel %vm932_vm3, %v3050_v57, %v3049_v30  ;;  %v2005_v17 = vpop.f32.mrb[24].mxu1 }
 0x57f   :  { %v3038_v31 = vrot.slane %v2005_v17, 4  ;;  %v2007_v9 = vpop.f32.mrb[25].mxu1 }
 0x580   :  { %v3052_v41 = vrot.slane %v2007_v9, 4 }
 0x581   :  { %v3039_v56 = vsel %vm934_vm4, %v3038_v31, %v3037_v4 }
 0x582   :  { %v3053_v54 = vsel %vm934_vm4, %v3052_v41, %v3051_v2  ;;  %v2095_v3 = vpop.f32.mrb[26].mxu1 }
 0x583   :  { %v3040_v53 = vrot.slane %v2095_v3, 3  ;;  %v2097_v49 = vpop.f32.mrb[27].mxu1 }
 0x584   :  { %v3054_v29 = vrot.slane %v2097_v49, 3 }
 0x585   :  { %v3041_v22 = vsel %vm936_vm5, %v3040_v53, %v3039_v56 }
 0x586   :  { %v3055_v55 = vsel %vm936_vm5, %v3054_v29, %v3053_v54  ;;  %v2185_v50 = vpop.f32.mrb[28].mxu1 }
 0x587   :  { %v3042_v21 = vrot.slane %v2185_v50, 2  ;;  %v2187_v51 = vpop.f32.mrb[29].mxu1 }
 0x588   :  { %v3056_v58 = vrot.slane %v2187_v51, 2 }
 0x589   :  { %v3043_v0 = vsel %vm938_vm6, %v3042_v21, %v3041_v22 }
 0x58a   :  { %v3057_v24 = vsel %vm938_vm6, %v3056_v58, %v3055_v55  ;;  %v2275_v11 = vpop.f32.mrb[30].mxu1 }
 0x58b   :  { %v3044_v62 = vrot.slane %v2275_v11, 1  ;;  %v2277_v16 = vpop.f32.mrb[31].mxu1 }
 0x58c   :  { %v3058_v45 = vrot.slane %v2277_v16, 1 }
 0x58d   :  { %v3045_v12 = vsel %vm940_vm7, %v3044_v62, %v3043_v0 }
 0x58e   :  { %3092 = vst [vmem:[#allocation8] sm:$0xff] %v3045_v12  ;;  %v3059_v15 = vsel %vm940_vm7, %v3058_v45, %v3057_v24  ;;  %v2365_v52 = vpop.f32.mrb[32].mxu1 }
 0x58f   :  { %3093 = vst [vmem:[#allocation8 + $0x8] sm:$0xff] %v3059_v15  ;;  %v2367_v40 = vpop.f32.mrb[33].mxu1 }
 0x592   :  { %v2455_v33 = vpop.f32.mrb[34].mxu1 }
 0x593   :  { %v3060_v36 = vrot.slane %v2455_v33, 7  ;;  %v2457_v46 = vpop.f32.mrb[35].mxu1 }
 0x594   :  { %v3074_v10 = vrot.slane %v2457_v46, 7 }
 0x595   :  { %v3061_v25 = vsel %vm928_vm1, %v3060_v36, %v2365_v52 }
 0x596   :  { %v3075_v34 = vsel %vm928_vm1, %v3074_v10, %v2367_v40  ;;  %v2545_v35 = vpop.f32.mrb[36].mxu1 }
 0x597   :  { %v3062_v27 = vrot.slane %v2545_v35, 6  ;;  %v2547_v5 = vpop.f32.mrb[37].mxu1 }
 0x598   :  { %v3076_v23 = vrot.slane %v2547_v5, 6 }
 0x599   :  { %v3063_v32 = vsel %vm930_vm2, %v3062_v27, %v3061_v25 }
 0x59a   :  { %v3077_v44 = vsel %vm930_vm2, %v3076_v23, %v3075_v34  ;;  %v2635_v63 = vpop.f32.mrb[38].mxu1 }
 0x59b   :  { %v3064_v13 = vrot.slane %v2635_v63, 5  ;;  %v2637_v26 = vpop.f32.mrb[39].mxu1 }
 0x59c   :  { %v3078_v14 = vrot.slane %v2637_v26, 5 }
 0x59d   :  { %v3065_v8 = vsel %vm932_vm3, %v3064_v13, %v3063_v32 }
 0x59e   :  { %v3079_v28 = vsel %vm932_vm3, %v3078_v14, %v3077_v44  ;;  %v2725_v48 = vpop.f32.mrb[40].mxu1 }
 0x59f   :  { %v3066_v20 = vrot.slane %v2725_v48, 4  ;;  %v2727_v37 = vpop.f32.mrb[41].mxu1 }
 0x5a0   :  { %v3080_v39 = vrot.slane %v2727_v37, 4 }
 0x5a1   :  { %v3067_v6 = vsel %vm934_vm4, %v3066_v20, %v3065_v8 }
 0x5a2   :  { %v3081_v61 = vsel %vm934_vm4, %v3080_v39, %v3079_v28  ;;  %v2815_v19 = vpop.f32.mrb[42].mxu1 }
 0x5a3   :  { %v3068_v7 = vrot.slane %v2815_v19, 3  ;;  %v2817_v38 = vpop.f32.mrb[43].mxu1 }
 0x5a4   :  { %v3082_v42 = vrot.slane %v2817_v38, 3 }
 0x5a5   :  { %v3069_v43 = vsel %vm936_vm5, %v3068_v7, %v3067_v6 }
 0x5a6   :  { %v3083_v60 = vsel %vm936_vm5, %v3082_v42, %v3081_v61  ;;  %v2905_v1 = vpop.f32.mrb[44].mxu1 }
 0x5a7   :  { %v3070_v30 = vrot.slane %v2905_v1, 2  ;;  %v2907_v18 = vpop.f32.mrb[45].mxu1 }
 0x5a8   :  { %v3084_v47 = vrot.slane %v2907_v18, 2 }
 0x5a9   :  { %v3071_v59 = vsel %vm938_vm6, %v3070_v30, %v3069_v43 }
 0x5aa   :  { %v3085_v57 = vsel %vm938_vm6, %v3084_v47, %v3083_v60  ;;  %v2995_v4 = vpop.f32.mrb[46].mxu1 }
 0x5ab   :  { %v3072_v2 = vrot.slane %v2995_v4, 1  ;;  %v2997_v17 = vpop.f32.mrb[47].mxu1 }
 0x5ac   :  { %v3086_v31 = vrot.slane %v2997_v17, 1 }
 0x5ad   :  { %v3073_v9 = vsel %vm940_vm7, %v3072_v2, %v3071_v59 }
 0x5ae   :  { %3094 = vst [vmem:[#allocation8 + $0x10] sm:$0xff] %v3073_v9  ;;  %v3087_v41 = vsel %vm940_vm7, %v3086_v31, %v3085_v57 }
 0x5af   :  { %3095 = vst [vmem:[#allocation8 + $0x18] sm:$0xff] %v3087_v41 }
 0x5b0   :  { %3637 = shalt.err (!%p3634_p0)
}
 0x5b1   :  { %s3638_s6 = scalar_lea.hbm %s4618_s4, 512 }
 0x5b2   :  { %p3639_p1 = scmp.ne.s32.totalorder %s4618_s4, %s3638_s6  ;;  %p3642_p2 = scmp.lt.u32.totalorder %s3638_s6, %s4618_s4 }
 0x5b4   :  { %p3644_p3 = pnand %p3642_p2, %p3639_p1 }
 0x5b6   :  { %3647 = shalt.err (!%p3644_p3)
}
 0x5b7   :  { %3107 = dma.vmem_to_hbm [thread:$0]  %s3102_s26, 512, %s4618_s4, [#allocation4], %s3656_s27, %s3656_s27, %s3657_s28  }
 0x5b8   :  { %3652 = dma.done.wait [#allocation4], 512  }
 0x5b9   :  { %3653 = vsyncadd [#allocation4], 4294966784 }
 0x5ba   :  { %3111 = vsyncpa [#allocation3], 1 }
 0x5bb   :  { %3112 = vsyncpa [#allocation6], 1 }
 0x5bc   :  { %3113 = vsyncpa [#allocation4], 1 }

</bundles_post_ra>
